<compile_context>
chip_gen: v5e
topology: v5e:2x2
jax: 0.10.0
libtpu: 0.0.40
codegen_flags: <defaults>
</compile_context>

<pallas_src>
import functools

import jax
import jax.numpy as jnp
from jax.experimental import pallas as pl
from jax.experimental.pallas import tpu as pltpu

BN_EPS = 1e-5
LANE = 128
_MIB = 1 << 20


def _round_up(v, m):
    return (v + m - 1) // m * m


def _vmem_limit(nbytes):
    """Scoped-VMEM request: 2x headroom, floored at 32 MiB, capped at the
    v7x-safe 64 MiB (raise the cap on v5e/v6e's 128 MiB if ever needed)."""
    return int(min(max(2 * nbytes + 2 * _MIB, 32 * _MIB), 64 * _MIB))


# ---------------------------------------------------------------------------
# FUSED whole-network kernel (grid-less, everything resident in VMEM)
# ---------------------------------------------------------------------------
def _make_fused_sage_kernel(num_layers, c_pad):
    """Kernel args: (A_bin, x, deg_inv, W_1..W_L, b_1..b_L, out, cat_scratch).

    Per layer (BN already folded into W/b at prep time):
        agg = (A_bin @ h) * deg_inv          # mean aggregation, MXU f32 acc
        cat[:, :C]  = agg (bf16)             # written into persistent scratch
        z   = cat @ W + b                    # both SAGE projections, one matmul
        cat[:, C:]  = relu(z) (bf16)         # hidden layers (next layer's h)
    """
    lo = pl.ds(0, c_pad)        # agg half of the concat scratch
    hi = pl.ds(c_pad, c_pad)    # h   half of the concat scratch

    def kernel(*refs):
        a_ref, x_ref, dinv_ref = refs[0], refs[1], refs[2]
        w_refs = refs[3:3 + num_layers]
        b_refs = refs[3 + num_layers:3 + 2 * num_layers]
        o_ref = refs[3 + 2 * num_layers]
        cat_ref = refs[4 + 2 * num_layers]

        cat_ref[:, hi] = x_ref[...]                    # layer-0 h
        dinv = dinv_ref[...]                           # [N_pad, 1] f32
        for li in range(num_layers):
            agg = jnp.dot(a_ref[...], cat_ref[:, hi],
                          preferred_element_type=jnp.float32) * dinv
            cat_ref[:, lo] = agg.astype(jnp.bfloat16)
            z = jnp.dot(cat_ref[...], w_refs[li][...],
                        preferred_element_type=jnp.float32) + b_refs[li][...]
            if li < num_layers - 1:
                # BN folded into W/b; dropout is identity at inference.
                cat_ref[:, hi] = jnp.maximum(z, 0.0).astype(jnp.bfloat16)
            else:
                o_ref[...] = z                          # lane-dense f32 store

    return kernel


@functools.partial(jax.jit, static_argnums=(5, 6))
def sage_forward_fused(A_bin, x_p, dinv, weights, biases, n_nodes, out_channels):
    """Single fused pallas_call over the padded, prepped operands."""
    num_layers = len(weights)
    n_pad, c_pad = x_p.shape
    inputs = (A_bin, x_p, dinv) + tuple(weights) + tuple(biases)

    in_bytes = sum(int(a.size) * a.dtype.itemsize for a in inputs)
    out_bytes = n_pad * c_pad * 4
    cat_bytes = n_pad * 2 * c_pad * 2
    flops = num_layers * (2 * n_pad * n_pad * c_pad           # A @ h
                          + 2 * n_pad * (2 * c_pad) * c_pad)  # fused projection

    vmem = pl.BlockSpec(memory_space=pltpu.MemorySpace.VMEM)
    out_p = pl.pallas_call(
        _make_fused_sage_kernel(num_layers, c_pad),
        out_shape=jax.ShapeDtypeStruct((n_pad, c_pad), jnp.float32),
        in_specs=[vmem] * len(inputs),
        out_specs=vmem,
        scratch_shapes=[pltpu.VMEM((n_pad, 2 * c_pad), jnp.bfloat16)],
        compiler_params=pltpu.CompilerParams(
            vmem_limit_bytes=_vmem_limit(in_bytes + out_bytes + cat_bytes)),
        cost_estimate=pl.CostEstimate(
            flops=int(flops), transcendentals=0,
            bytes_accessed=int(in_bytes + out_bytes)),
    )(*inputs)
    return out_p[:n_nodes, :out_channels]


# ---------------------------------------------------------------------------
# TILED per-layer kernel (row-parallel grid; v7x megacore / large graphs)
# ---------------------------------------------------------------------------
def _make_layer_kernel(c_pad, tm, apply_relu):
    def kernel(a_ref, h_ref, dinv_ref, w_ref, b_ref, o_ref):
        i = pl.program_id(0)
        row0 = pl.multiple_of(i * tm, tm)
        # mean aggregation for this row tile (A streamed, h resident)
        agg = jnp.dot(a_ref[...], h_ref[...],
                      preferred_element_type=jnp.float32) * dinv_ref[...]
        h_tile = h_ref[pl.ds(row0, tm), :]
        # both SAGE projections as two K=c_pad dots against static weight slices
        z = (jnp.dot(agg.astype(jnp.bfloat16), w_ref[pl.ds(0, c_pad), :],
                     preferred_element_type=jnp.float32)
             + jnp.dot(h_tile, w_ref[pl.ds(c_pad, c_pad), :],
                       preferred_element_type=jnp.float32)
             + b_ref[...])
        if apply_relu:
            o_ref[...] = jnp.maximum(z, 0.0).astype(o_ref.dtype)
        else:
            o_ref[...] = z.astype(o_ref.dtype)

    return kernel


def _sage_layer_tiled(A_bin, h, dinv, W, b, out_dtype, apply_relu, tm):
    n_pad, c_pad = h.shape
    grid = (n_pad // tm,)
    in_bytes = (tm * n_pad * 2 + n_pad * c_pad * 2 + tm * 4
                + 2 * c_pad * c_pad * 2 + c_pad * 4)
    out_bytes = tm * c_pad * jnp.dtype(out_dtype).itemsize
    return pl.pallas_call(
        _make_layer_kernel(c_pad, tm, apply_relu),
        out_shape=jax.ShapeDtypeStruct((n_pad, c_pad), out_dtype),
        grid=grid,
        in_specs=[
            pl.BlockSpec((tm, n_pad), lambda i: (i, 0)),         # A row tile (streamed)
            pl.BlockSpec((n_pad, c_pad), lambda i: (0, 0)),      # full h (resident)
            pl.BlockSpec((tm, 1), lambda i: (i, 0)),             # deg_inv row tile
            pl.BlockSpec((2 * c_pad, c_pad), lambda i: (0, 0)),  # fused W (resident)
            pl.BlockSpec((1, c_pad), lambda i: (0, 0)),          # folded bias
        ],
        out_specs=pl.BlockSpec((tm, c_pad), lambda i: (i, 0)),
        compiler_params=pltpu.CompilerParams(
            dimension_semantics=("parallel",),
            vmem_limit_bytes=_vmem_limit(in_bytes + out_bytes)),
        cost_estimate=pl.CostEstimate(
            flops=int(2 * n_pad * n_pad * c_pad + 2 * n_pad * 2 * c_pad * c_pad),
            transcendentals=0,
            bytes_accessed=int(n_pad * n_pad * 2 + 2 * n_pad * c_pad * 2
                               + 2 * c_pad * c_pad * 2 + n_pad * 4)),
    )(A_bin, h, dinv, W, b)


@functools.partial(jax.jit, static_argnums=(5, 6, 7))
def sage_forward_tiled(A_bin, x_p, dinv, weights, biases, n_nodes, out_channels,
                       tm):
    num_layers = len(weights)
    h = x_p
    for li in range(num_layers):
        last = li == num_layers - 1
        h = _sage_layer_tiled(A_bin, h, dinv, weights[li], biases[li],
                              jnp.float32 if last else jnp.bfloat16,
                              not last, tm)
    return h[:n_nodes, :out_channels]


# ---------------------------------------------------------------------------
# Parameters (raw, PyTorch-equivalent) + one-time kernel-side prep
# ---------------------------------------------------------------------------
def init_sage_params(key, in_channels, hidden_channels, out_channels, num_layers):
    """Raw parameters; linear weights stored pre-transposed as [C_in, C_out]."""
    dims = [in_channels] + [hidden_channels] * (num_layers - 1) + [out_channels]
    params = []
    for li in range(num_layers):
        cin, cout = dims[li], dims[li + 1]
        key, k1, k2, k3 = jax.random.split(key, 4)
        scale = 1.0 / jnp.sqrt(jnp.float32(cin))
        layer = {
            "Wl": jax.random.uniform(k1, (cin, cout), jnp.float32, -scale, scale),
            "Wr": jax.random.uniform(k2, (cin, cout), jnp.float32, -scale, scale),
            "bl": jax.random.uniform(k3, (1, cout), jnp.float32, -scale, scale),
        }
        if li < num_layers - 1:  # hidden layers have BatchNorm1d
            key, k4, k5 = jax.random.split(key, 3)
            layer["bn"] = (
                1.0 + 0.1 * jax.random.normal(k4, (1, cout), jnp.float32),  # gamma
                0.1 * jax.random.normal(k5, (1, cout), jnp.float32),        # beta
                jnp.zeros((1, cout), jnp.float32),                          # running_mean
                jnp.ones((1, cout), jnp.float32),                           # running_var
            )
        params.append(layer)
    return params


def prepare_kernel_params(params, c_pad):
    """One-time constant folding (done at init, NOT per call):
       - fold BN into W and b,
       - concatenate [Wl; Wr] into one [2*C_pad, C_pad] matrix,
       - zero-pad channels to the 128-lane width,
       - cast weights to bf16 (biases stay f32 for the f32 epilogue)."""
    weights, biases = [], []
    for layer in params:
        Wl, Wr, bl = layer["Wl"], layer["Wr"], layer["bl"]
        cin, cout = Wl.shape
        if "bn" in layer:
            gamma, beta, mean, var = layer["bn"]
            s = gamma * jax.lax.rsqrt(var + BN_EPS)          # [1, Cout]
            shift = beta - mean * s
        else:
            s = jnp.ones((1, cout), jnp.float32)
            shift = jnp.zeros((1, cout), jnp.float32)
        Wl_f, Wr_f = Wl * s, Wr * s
        b_f = bl * s + shift
        Wl_p = jnp.zeros((c_pad, c_pad), jnp.float32).at[:cin, :cout].set(Wl_f)
        Wr_p = jnp.zeros((c_pad, c_pad), jnp.float32).at[:cin, :cout].set(Wr_f)
        weights.append(jnp.concatenate([Wl_p, Wr_p], axis=0).astype(jnp.bfloat16))
        biases.append(jnp.zeros((1, c_pad), jnp.float32).at[:, :cout].set(b_f))
    return tuple(weights), tuple(biases)


def prepare_inputs(x, adj, n_pad, c_pad):
    """Pad x to (n_pad, c_pad) bf16; adjacency stays EXACT binary {0,1} bf16
    with the 1/deg mean normalization deferred to an f32 per-row vector."""
    n, cin = x.shape
    x_p = jnp.zeros((n_pad, c_pad), jnp.bfloat16).at[:n, :cin].set(
        x.astype(jnp.bfloat16))
    a_bin = jnp.zeros((n_pad, n_pad), jnp.bfloat16).at[:n, :n].set(
        (adj > 0).astype(jnp.bfloat16))
    deg = jnp.sum((adj > 0).astype(jnp.float32), axis=1)
    dinv = jnp.where(deg > 0, 1.0 / jnp.maximum(deg, 1.0), 0.0)
    dinv_p = jnp.zeros((n_pad, 1), jnp.float32).at[:n, 0].set(dinv)
    return a_bin, x_p, dinv_p


# ---------------------------------------------------------------------------
# Pure-JAX references
# ---------------------------------------------------------------------------
def sage_forward_ref(x, A_mean, params):
    """Exact module semantics in f32 (SAGEConv mean -> BN(eval) -> ReLU)."""
    for layer in params[:-1]:
        agg = A_mean @ x
        h = agg @ layer["Wl"] + layer["bl"] + x @ layer["Wr"]
        g, b, m, v = layer["bn"]
        h = (h - m) / jnp.sqrt(v + BN_EPS) * g + b
        x = jnp.maximum(h, 0.0)
    last = params[-1]
    return (A_mean @ x) @ last["Wl"] + last["bl"] + x @ last["Wr"]


def sage_forward_padded_ref(A_bin, x_p, dinv, weights, biases):
    """Same folded/padded/bf16 math as the kernels, in plain JAX (tight check)."""
    h = x_p
    for li, (W, b) in enumerate(zip(weights, biases)):
        agg = jnp.dot(A_bin, h, preferred_element_type=jnp.float32) * dinv
        cat = jnp.concatenate([agg.astype(jnp.bfloat16), h], axis=-1)
        z = jnp.dot(cat, W, preferred_element_type=jnp.float32) + b
        if li < len(weights) - 1:
            h = jnp.maximum(z, 0.0).astype(jnp.bfloat16)
        else:
            return z


# ---------------------------------------------------------------------------
# Demo / correctness check
# ---------------------------------------------------------------------------
if __name__ == "__main__":
    key = jax.random.PRNGKey(0)

    # Small, module-consistent shapes.
    N = 64
    in_channels = 16
    hidden_channels = 32
    out_channels = 8
    num_layers = 3
    dropout = 0.5  # identity at inference (training=False)

    # Node features.
    key, kx, ka = jax.random.split(key, 3)
    x = jax.random.normal(kx, (N, in_channels), jnp.float32)

    # Random sparse binary adjacency (no self loops) + dense mean matrix (ref).
    adj = (jax.random.uniform(ka, (N, N)) < 0.1).astype(jnp.float32)
    adj = adj * (1.0 - jnp.eye(N))
    deg = jnp.sum(adj, axis=1, keepdims=True)
    A_mean = jnp.where(deg > 0, adj / jnp.maximum(deg, 1.0), 0.0)

    # Raw parameters (deterministic).
    params = init_sage_params(jax.random.PRNGKey(0), in_channels,
                              hidden_channels, out_channels, num_layers)

    # One-time prep: fold BN, fuse the two projections, pad to 128 lanes, bf16.
    C_PAD = _round_up(max(in_channels, hidden_channels, out_channels), LANE)
    N_PAD = _round_up(N, LANE)
    weights, biases = prepare_kernel_params(params, C_PAD)
    A_bin, x_p, dinv = prepare_inputs(x, adj, N_PAD, C_PAD)

    # Fused whole-network kernel (default path).
    out = sage_forward_fused(A_bin, x_p, dinv, weights, biases, N, out_channels)
    out = jax.block_until_ready(out)
    assert out.shape == (N, out_channels)

    # Row-tiled per-layer kernel (large-graph / v7x megacore path).
    out_tiled = sage_forward_tiled(A_bin, x_p, dinv, weights, biases, N,
                                   out_channels, LANE)
    out_tiled = jax.block_until_ready(out_tiled)
    assert out_tiled.shape == (N, out_channels)

    # Tight check: kernels vs identical bf16-input math in plain JAX.
    ref_bf16 = sage_forward_padded_ref(A_bin, x_p, dinv, weights, biases)
    ref_bf16 = ref_bf16[:N, :out_channels]
    assert jnp.allclose(out, ref_bf16, atol=2e-3, rtol=2e-3), (
        "fused kernel mismatch vs bf16-path reference: "
        f"{jnp.max(jnp.abs(out - ref_bf16))}")
    assert jnp.allclose(out_tiled, ref_bf16, atol=2e-3, rtol=2e-3), (
        "tiled kernel mismatch vs bf16-path reference: "
        f"{jnp.max(jnp.abs(out_tiled - ref_bf16))}")

    # End-to-end vs exact f32 module semantics.  Tolerance is much tighter than
    # before because A is stored exactly and 1/deg is applied in f32; residual
    # error is only the bf16 quantization of x/h/W.
    ref_f32 = sage_forward_ref(x, A_mean, params)
    assert jnp.allclose(out, ref_f32, atol=5e-2, rtol=5e-2), (
        f"fused mismatch vs f32 reference: {jnp.max(jnp.abs(out - ref_f32))}")
    assert jnp.allclose(out_tiled, ref_f32, atol=5e-2, rtol=5e-2), (
        f"tiled mismatch vs f32 reference: {jnp.max(jnp.abs(out_tiled - ref_f32))}")

    print("KERNEL_OK")
</pallas_src>

<mosaic_0001>
module attributes {stable_mosaic.version = 11 : i64} {
  func.func @kernel(%arg0: memref<128x128xbf16, #tpu.memory_space<vmem>>, %arg1: memref<128x128xbf16, #tpu.memory_space<vmem>>, %arg2: memref<128x1xf32, #tpu.memory_space<vmem>>, %arg3: memref<256x128xbf16, #tpu.memory_space<vmem>>, %arg4: memref<256x128xbf16, #tpu.memory_space<vmem>>, %arg5: memref<256x128xbf16, #tpu.memory_space<vmem>>, %arg6: memref<1x128xf32, #tpu.memory_space<vmem>>, %arg7: memref<1x128xf32, #tpu.memory_space<vmem>>, %arg8: memref<1x128xf32, #tpu.memory_space<vmem>>, %arg9: memref<128x128xf32, #tpu.memory_space<vmem>>, %arg10: memref<128x256xbf16, #tpu.memory_space<vmem>>) attributes {dimension_semantics = [], scalar_prefetch = 0 : i64, scratch_operands = 1 : i64, tpu.core_type = #tpu.core_type<tc>} {
    %c0 = arith.constant 0 : index
    %c0_0 = arith.constant 0 : index
    %0 = vector.load %arg1[%c0, %c0_0] : memref<128x128xbf16, #tpu.memory_space<vmem>>, vector<128x128xbf16>
    %c0_1 = arith.constant 0 : index
    %c128 = arith.constant 128 : index
    %1 = vector.load %arg10[%c0_1, %c128] : memref<128x256xbf16, #tpu.memory_space<vmem>>, vector<128x128xbf16>
    tpu.vector_store %arg10[%c0_1, %c128], %0 {strides = array<i32>} : memref<128x256xbf16, #tpu.memory_space<vmem>>, vector<128x128xbf16>,
    %c0_2 = arith.constant 0 : index
    %c0_3 = arith.constant 0 : index
    %2 = vector.load %arg2[%c0_2, %c0_3] : memref<128x1xf32, #tpu.memory_space<vmem>>, vector<128x1xf32>
    %c0_4 = arith.constant 0 : index
    %c0_5 = arith.constant 0 : index
    %3 = vector.load %arg0[%c0_4, %c0_5] : memref<128x128xbf16, #tpu.memory_space<vmem>>, vector<128x128xbf16>
    %c0_6 = arith.constant 0 : index
    %c128_7 = arith.constant 128 : index
    %4 = vector.load %arg10[%c0_6, %c128_7] : memref<128x256xbf16, #tpu.memory_space<vmem>>, vector<128x128xbf16>
    %cst = arith.constant dense<0.000000e+00> : vector<128x128xf32>
    %5 = tpu.matmul %3, %4, %cst {dimension_numbers = #tpu.dot_dimension_numbers<[1], [0], [0], [1], [0, 0, 1, 1], [], []>} : vector<128x128xbf16>, vector<128x128xbf16>, vector<128x128xf32> -> vector<128x128xf32>
    %6 = vector.broadcast %2 : vector<128x1xf32> to vector<128x128xf32>
    %7 = arith.mulf %5, %6 : vector<128x128xf32>
    %8 = arith.truncf %7 : vector<128x128xf32> to vector<128x128xbf16>
    %c0_8 = arith.constant 0 : index
    %c0_9 = arith.constant 0 : index
    %9 = vector.load %arg10[%c0_8, %c0_9] : memref<128x256xbf16, #tpu.memory_space<vmem>>, vector<128x128xbf16>
    tpu.vector_store %arg10[%c0_8, %c0_9], %8 {strides = array<i32>} : memref<128x256xbf16, #tpu.memory_space<vmem>>, vector<128x128xbf16>,
    %c0_10 = arith.constant 0 : index
    %c0_11 = arith.constant 0 : index
    %10 = vector.load %arg10[%c0_10, %c0_11] : memref<128x256xbf16, #tpu.memory_space<vmem>>, vector<128x256xbf16>
    %c0_12 = arith.constant 0 : index
    %c0_13 = arith.constant 0 : index
    %11 = vector.load %arg3[%c0_12, %c0_13] : memref<256x128xbf16, #tpu.memory_space<vmem>>, vector<256x128xbf16>
    %cst_14 = arith.constant dense<0.000000e+00> : vector<128x128xf32>
    %12 = tpu.matmul %10, %11, %cst_14 {dimension_numbers = #tpu.dot_dimension_numbers<[1], [0], [0], [1], [0, 0, 1, 1], [], []>} : vector<128x256xbf16>, vector<256x128xbf16>, vector<128x128xf32> -> vector<128x128xf32>
    %c0_15 = arith.constant 0 : index
    %c0_16 = arith.constant 0 : index
    %13 = vector.load %arg6[%c0_15, %c0_16] : memref<1x128xf32, #tpu.memory_space<vmem>>, vector<1x128xf32>
    %14 = vector.broadcast %13 : vector<1x128xf32> to vector<128x128xf32>
    %15 = arith.addf %12, %14 : vector<128x128xf32>
    %cst_17 = arith.constant 0.000000e+00 : f32
    %16 = vector.broadcast %cst_17 : f32 to vector<128x128xf32>
    %17 = arith.maximumf %15, %16 : vector<128x128xf32>
    %18 = arith.truncf %17 : vector<128x128xf32> to vector<128x128xbf16>
    %c0_18 = arith.constant 0 : index
    %c128_19 = arith.constant 128 : index
    %19 = vector.load %arg10[%c0_18, %c128_19] : memref<128x256xbf16, #tpu.memory_space<vmem>>, vector<128x128xbf16>
    tpu.vector_store %arg10[%c0_18, %c128_19], %18 {strides = array<i32>} : memref<128x256xbf16, #tpu.memory_space<vmem>>, vector<128x128xbf16>,
    %c0_20 = arith.constant 0 : index
    %c0_21 = arith.constant 0 : index
    %20 = vector.load %arg0[%c0_20, %c0_21] : memref<128x128xbf16, #tpu.memory_space<vmem>>, vector<128x128xbf16>
    %c0_22 = arith.constant 0 : index
    %c128_23 = arith.constant 128 : index
    %21 = vector.load %arg10[%c0_22, %c128_23] : memref<128x256xbf16, #tpu.memory_space<vmem>>, vector<128x128xbf16>
    %cst_24 = arith.constant dense<0.000000e+00> : vector<128x128xf32>
    %22 = tpu.matmul %20, %21, %cst_24 {dimension_numbers = #tpu.dot_dimension_numbers<[1], [0], [0], [1], [0, 0, 1, 1], [], []>} : vector<128x128xbf16>, vector<128x128xbf16>, vector<128x128xf32> -> vector<128x128xf32>
    %23 = vector.broadcast %2 : vector<128x1xf32> to vector<128x128xf32>
    %24 = arith.mulf %22, %23 : vector<128x128xf32>
    %25 = arith.truncf %24 : vector<128x128xf32> to vector<128x128xbf16>
    %c0_25 = arith.constant 0 : index
    %c0_26 = arith.constant 0 : index
    %26 = vector.load %arg10[%c0_25, %c0_26] : memref<128x256xbf16, #tpu.memory_space<vmem>>, vector<128x128xbf16>
    tpu.vector_store %arg10[%c0_25, %c0_26], %25 {strides = array<i32>} : memref<128x256xbf16, #tpu.memory_space<vmem>>, vector<128x128xbf16>,
    %c0_27 = arith.constant 0 : index
    %c0_28 = arith.constant 0 : index
    %27 = vector.load %arg10[%c0_27, %c0_28] : memref<128x256xbf16, #tpu.memory_space<vmem>>, vector<128x256xbf16>
    %c0_29 = arith.constant 0 : index
    %c0_30 = arith.constant 0 : index
    %28 = vector.load %arg4[%c0_29, %c0_30] : memref<256x128xbf16, #tpu.memory_space<vmem>>, vector<256x128xbf16>
    %cst_31 = arith.constant dense<0.000000e+00> : vector<128x128xf32>
    %29 = tpu.matmul %27, %28, %cst_31 {dimension_numbers = #tpu.dot_dimension_numbers<[1], [0], [0], [1], [0, 0, 1, 1], [], []>} : vector<128x256xbf16>, vector<256x128xbf16>, vector<128x128xf32> -> vector<128x128xf32>
    %c0_32 = arith.constant 0 : index
    %c0_33 = arith.constant 0 : index
    %30 = vector.load %arg7[%c0_32, %c0_33] : memref<1x128xf32, #tpu.memory_space<vmem>>, vector<1x128xf32>
    %31 = vector.broadcast %30 : vector<1x128xf32> to vector<128x128xf32>
    %32 = arith.addf %29, %31 : vector<128x128xf32>
    %cst_34 = arith.constant 0.000000e+00 : f32
    %33 = vector.broadcast %cst_34 : f32 to vector<128x128xf32>
    %34 = arith.maximumf %32, %33 : vector<128x128xf32>
    %35 = arith.truncf %34 : vector<128x128xf32> to vector<128x128xbf16>
    %c0_35 = arith.constant 0 : index
    %c128_36 = arith.constant 128 : index
    %36 = vector.load %arg10[%c0_35, %c128_36] : memref<128x256xbf16, #tpu.memory_space<vmem>>, vector<128x128xbf16>
    tpu.vector_store %arg10[%c0_35, %c128_36], %35 {strides = array<i32>} : memref<128x256xbf16, #tpu.memory_space<vmem>>, vector<128x128xbf16>,
    %c0_37 = arith.constant 0 : index
    %c0_38 = arith.constant 0 : index
    %37 = vector.load %arg0[%c0_37, %c0_38] : memref<128x128xbf16, #tpu.memory_space<vmem>>, vector<128x128xbf16>
    %c0_39 = arith.constant 0 : index
    %c128_40 = arith.constant 128 : index
    %38 = vector.load %arg10[%c0_39, %c128_40] : memref<128x256xbf16, #tpu.memory_space<vmem>>, vector<128x128xbf16>
    %cst_41 = arith.constant dense<0.000000e+00> : vector<128x128xf32>
    %39 = tpu.matmul %37, %38, %cst_41 {dimension_numbers = #tpu.dot_dimension_numbers<[1], [0], [0], [1], [0, 0, 1, 1], [], []>} : vector<128x128xbf16>, vector<128x128xbf16>, vector<128x128xf32> -> vector<128x128xf32>
    %40 = vector.broadcast %2 : vector<128x1xf32> to vector<128x128xf32>
    %41 = arith.mulf %39, %40 : vector<128x128xf32>
    %42 = arith.truncf %41 : vector<128x128xf32> to vector<128x128xbf16>
    %c0_42 = arith.constant 0 : index
    %c0_43 = arith.constant 0 : index
    %43 = vector.load %arg10[%c0_42, %c0_43] : memref<128x256xbf16, #tpu.memory_space<vmem>>, vector<128x128xbf16>
    tpu.vector_store %arg10[%c0_42, %c0_43], %42 {strides = array<i32>} : memref<128x256xbf16, #tpu.memory_space<vmem>>, vector<128x128xbf16>,
    %c0_44 = arith.constant 0 : index
    %c0_45 = arith.constant 0 : index
    %44 = vector.load %arg10[%c0_44, %c0_45] : memref<128x256xbf16, #tpu.memory_space<vmem>>, vector<128x256xbf16>
    %c0_46 = arith.constant 0 : index
    %c0_47 = arith.constant 0 : index
    %45 = vector.load %arg5[%c0_46, %c0_47] : memref<256x128xbf16, #tpu.memory_space<vmem>>, vector<256x128xbf16>
    %cst_48 = arith.constant dense<0.000000e+00> : vector<128x128xf32>
    %46 = tpu.matmul %44, %45, %cst_48 {dimension_numbers = #tpu.dot_dimension_numbers<[1], [0], [0], [1], [0, 0, 1, 1], [], []>} : vector<128x256xbf16>, vector<256x128xbf16>, vector<128x128xf32> -> vector<128x128xf32>
    %c0_49 = arith.constant 0 : index
    %c0_50 = arith.constant 0 : index
    %47 = vector.load %arg8[%c0_49, %c0_50] : memref<1x128xf32, #tpu.memory_space<vmem>>, vector<1x128xf32>
    %48 = vector.broadcast %47 : vector<1x128xf32> to vector<128x128xf32>
    %49 = arith.addf %46, %48 : vector<128x128xf32>
    %c0_51 = arith.constant 0 : index
    %c0_52 = arith.constant 0 : index
    %50 = vector.load %arg9[%c0_51, %c0_52] : memref<128x128xf32, #tpu.memory_space<vmem>>, vector<128x128xf32>
    tpu.vector_store %arg9[%c0_51, %c0_52], %49 {strides = array<i32>} : memref<128x128xf32, #tpu.memory_space<vmem>>, vector<128x128xf32>,
    return
  }
}

</mosaic_0001>

<bundles_post_ra>
// kernel: sage_forward_fused.1
= control target key start
LH: loop header
LB: loop body
LE: loop exit
PB: predicated region body
PF: predicated region fallthrough
CT: control target
= control target key end

     0   :  { %14 = vsyncpa [#allocation4], 0  ;;  %s3210_s0 = inlined_call_operand.hbm [shape: bf16[128,128], index: 0, kind: input, shape index: {}]   ;;  %s3211_s1 = inlined_call_operand.hbm [shape: bf16[128,128], index: 1, kind: input, shape index: {}]   ;;  %s3212_s2 = inlined_call_operand.vmem [shape: f32[128,1], index: 2, kind: input, shape index: {}]   ;;  %s3213_s3 = inlined_call_operand.vmem [shape: bf16[256,128], index: 3, kind: input, shape index: {}]   ;;  %s3214_s4 = inlined_call_operand.hbm [shape: bf16[256,128], index: 4, kind: input, shape index: {}]   ;;  %s3215_s5 = inlined_call_operand.hbm [shape: bf16[256,128], index: 5, kind: input, shape index: {}]   ;;  %s3216_s6 = inlined_call_operand.vmem [shape: f32[1,128], index: 6, kind: input, shape index: {}]   ;;  %s3217_s7 = inlined_call_operand.vmem [shape: f32[1,128], index: 7, kind: input, shape index: {}]   ;;  %s3218_s8 = inlined_call_operand.vmem [shape: f32[1,128], index: 8, kind: input, shape index: {}]   ;;  %s3219_s9 = inlined_call_operand.vmem [shape: f32[128,128], index: 9, kind: output, shape index: {}]  }
   0x1   :  { %15 = vsyncpa [#allocation6], 0 }
   0x2   :  { %16 = vsyncpa [#allocation9], 0  ;;  %s34_s11 = sshll.u32 %s3211_s1, 4  ;;  %s2854_s12 = smov [#allocation5]   ;;  %s35_s11 = int_to_ptr.hbm [resolvable:$true] %s34_s11 }
   0x3   :  { %s36_s13 = sshll.u32 %s2854_s12, 4  ;;  %s21_s16 = sshll.u32 %s3210_s0, 4  ;;  %s37_s13 = int_to_ptr.vmem [resolvable:$true] %s36_s13  ;;  %s22_s16 = int_to_ptr.hbm [resolvable:$true] %s21_s16 }
   0x4   :  { %s2855_s17 = smov 64   ;;  %s2856_s18 = smov 4  }
   0x5   :  { %42 = dma.hbm_to_vmem [thread:$0]  %s35_s11, 1024, %s37_s13, [#allocation6], %s2855_s17, %s2855_s17, %s2856_s18  }
   0x6   :  { %s2857_s19 = smov [#allocation3]   ;;  %s51_s23 = sshll.u32 %s3214_s4, 4  ;;  %s52_s23 = int_to_ptr.hbm [resolvable:$true] %s51_s23 }
   0x7   :  { %s23_s20 = sshll.u32 %s2857_s19, 4  ;;  %s64_s25 = sshll.u32 %s3215_s5, 4  ;;  %s24_s20 = int_to_ptr.vmem [resolvable:$true] %s23_s20  ;;  %s65_s25 = int_to_ptr.hbm [resolvable:$true] %s64_s25 }
   0x8   :  { %29 = dma.hbm_to_vmem [thread:$0]  %s22_s16, 1024, %s24_s20, [#allocation4], %s2855_s17, %s2855_s17, %s2856_s18  }
   0x9   :  { %s2858_s26 = smov [#allocation7]   ;;  %s2859_s0 = smov [#allocation8]  }
   0xa   :  { %s53_s27 = sshll.u32 %s2858_s26, 4  ;;  %s66_s28 = sshll.u32 %s2859_s0, 4  ;;  %s54_s27 = int_to_ptr.vmem [resolvable:$true] %s53_s27  ;;  %s67_s28 = int_to_ptr.vmem [resolvable:$true] %s66_s28 }
   0xb   :  { %59 = dma.hbm_to_vmem [thread:$0]  %s52_s23, 2048, %s54_s27, [#allocation6], %s2855_s17, %s2855_s17, %s2856_s18  }
   0xc   :  { %72 = dma.hbm_to_vmem [thread:$0]  %s65_s25, 2048, %s67_s28, [#allocation9], %s2855_s17, %s2855_s17, %s2856_s18  }
   0xd   :  { %2848 = dma.done.wait [#allocation4], 1024  }
   0xe   :  { %2849 = vsyncadd [#allocation4], 4294966272 }
   0xf   :  { %2850 = dma.done.wait [#allocation6], 3072  }
  0x10   :  { %2851 = vsyncadd [#allocation6], 4294964224 }
  0x11   :  { %2852 = dma.done.wait [#allocation9], 2048  }
  0x12   :  { %2853 = vsyncadd [#allocation9], 4294965248  ;;  %v2860_v0 = vmov 0   ;;  %v109_v1 = vld [vmem:[#allocation5 + $0x38] sm:$0xf]  ;;  %v127_v3 = vld [vmem:[%s3212_s2] sm:$0xff] }
  0x13   :  { %2746 = vset.pattern.permute.xlu0 %v2860_v0  ;;  %2747 = vset.pattern.permute.xlu1 %v2860_v0  ;;  %v110_v2 = vld [vmem:[#allocation5 + $0x3c] sm:$0xf]  ;;  %125 = vst [vmem:[#allocation2 + $0x74] sm:$0xf] %v109_v1  ;;  %v107_v4 = vld [vmem:[#allocation5 + $0x30] sm:$0xf] }
  0x14   :  { %2748 = vset.pattern.permute.xlu2 %v2860_v0  ;;  %322 = vperm.xlu0 %2746, %v127_v3   ;;  %v108_v5 = vld [vmem:[#allocation5 + $0x34] sm:$0xf]  ;;  %126 = vst [vmem:[#allocation2 + $0x7c] sm:$0xf] %v110_v2  ;;  %v105_v6 = vld [vmem:[#allocation5 + $0x28] sm:$0xf] }
  0x15   :  { %123 = vst [vmem:[#allocation2 + $0x64] sm:$0xf] %v107_v4  ;;  %v106_v7 = vld [vmem:[#allocation5 + $0x2c] sm:$0xf]  ;;  %v103_v8 = vld [vmem:[#allocation5 + $0x20] sm:$0xf] }
  0x16   :  { %124 = vst [vmem:[#allocation2 + $0x6c] sm:$0xf] %v108_v5  ;;  %v104_v9 = vld [vmem:[#allocation5 + $0x24] sm:$0xf]  ;;  %v128_v10 = vld [vmem:[%s3212_s2 + $0x8] sm:$0xff]  ;;  %v129_v12 = vld [vmem:[%s3212_s2 + $0x10] sm:$0xff] }
  0x17   :  { %121 = vst [vmem:[#allocation2 + $0x54] sm:$0xf] %v105_v6  ;;  %v101_v11 = vld [vmem:[#allocation5 + $0x18] sm:$0xf]  ;;  %v102_v13 = vld [vmem:[#allocation5 + $0x1c] sm:$0xf]  ;;  %332 = vperm.xlu1 %2747, %v129_v12  }
  0x18   :  { %122 = vst [vmem:[#allocation2 + $0x5c] sm:$0xf] %v106_v7  ;;  %v99_v14 = vld [vmem:[#allocation5 + $0x10] sm:$0xf]  ;;  %v100_v16 = vld [vmem:[#allocation5 + $0x14] sm:$0xf] }
  0x19   :  { %119 = vst [vmem:[#allocation2 + $0x44] sm:$0xf] %v103_v8  ;;  %v97_v18 = vld [vmem:[#allocation5 + $0x8] sm:$0xf]  ;;  %v98_v21 = vld [vmem:[#allocation5 + $0xc] sm:$0xf] }
  0x1a   :  { %v2057_v15 = vld [vmem:[#allocation2 + $0x74] sm:$0xf]  ;;  %120 = vst [vmem:[#allocation2 + $0x4c] sm:$0xf] %v104_v9  ;;  %v95_v23 = vld [vmem:[#allocation5] sm:$0xf] }
  0x1b   :  { %v2586_v17 = vld [vmem:[#allocation2 + $0x78] sm:$0xf0]  ;;  %117 = vst [vmem:[#allocation2 + $0x34] sm:$0xf] %v101_v11  ;;  %v96_v25 = vld [vmem:[#allocation5 + $0x4] sm:$0xf] }
  0x1c   :  { %327 = vperm.xlu0 %2746, %v128_v10   ;;  %v2058_v19 = vor.u32 %v2586_v17, %v2057_v15  ;;  %v2053_v20 = vld [vmem:[#allocation2 + $0x64] sm:$0xf]  ;;  %118 = vst [vmem:[#allocation2 + $0x3c] sm:$0xf] %v102_v13  ;;  %v130_v26 = vld [vmem:[%s3212_s2 + $0x18] sm:$0xff]  ;;  %v133_v29 = vld [vmem:[%s3212_s2 + $0x30] sm:$0xff] }
  0x1d   :  { %v2585_v22 = vld [vmem:[#allocation2 + $0x68] sm:$0xf0]  ;;  %115 = vst [vmem:[#allocation2 + $0x24] sm:$0xf] %v99_v14  ;;  %v134_v34 = vld [vmem:[%s3212_s2 + $0x38] sm:$0xff]  ;;  %v137_v42 = vld [vmem:[%s3212_s2 + $0x50] sm:$0xff] }
  0x1e   :  { %271 = vmatpush.bf16.msra.mxu0 %v2058_v19  ;;  %2715 = vmatpush.bf16.msra.mxu1 %v2058_v19  ;;  %v2054_v24 = vor.u32 %v2585_v22, %v2053_v20  ;;  %116 = vst [vmem:[#allocation2 + $0x2c] sm:$0xf] %v100_v16  ;;  %v2049_v27 = vld [vmem:[#allocation2 + $0x54] sm:$0xf]  ;;  %v136_v37 = vld [vmem:[%s3212_s2 + $0x48] sm:$0xff]  ;;  %v131_v43 = vld [vmem:[%s3212_s2 + $0x20] sm:$0xff] }
  0x1f   :  { %2716 = vmatpush.bf16.msra.mxu2 %v2058_v19  ;;  %2717 = vmatpush.bf16.msra.mxu3 %v2058_v19  ;;  %v2584_v28 = vld [vmem:[#allocation2 + $0x58] sm:$0xf0]  ;;  %113 = vst [vmem:[#allocation2 + $0x14] sm:$0xf] %v97_v18  ;;  %v139_v46 = vld [vmem:[%s3212_s2 + $0x60] sm:$0xff]  ;;  %v132_v50 = vld [vmem:[%s3212_s2 + $0x28] sm:$0xff] }
  0x20   :  { %114 = vst [vmem:[#allocation2 + $0x1c] sm:$0xf] %v98_v21  ;;  %337 = vperm.xlu1 %2747, %v130_v26   ;;  %v2050_v30 = vor.u32 %v2584_v28, %v2049_v27  ;;  %v2045_v31 = vld [vmem:[#allocation2 + $0x44] sm:$0xf]  ;;  %342 = vperm.xlu2 %2748, %v131_v43   ;;  %v140_v52 = vld [vmem:[%s3212_s2 + $0x68] sm:$0xff]  ;;  %v2573_v54 = vld [vmem:[#allocation3 + $0x10] sm:$0xff] }
  0x21   :  { %111 = vst [vmem:[#allocation2 + $0x4] sm:$0xf] %v95_v23  ;;  %v2583_v32 = vld [vmem:[#allocation2 + $0x48] sm:$0xf0]  ;;  %v2571_v53 = vld [vmem:[#allocation3] sm:$0xff]  ;;  %v142_v55 = vld [vmem:[%s3212_s2 + $0x78] sm:$0xff] }
  0x22   :  { %272 = vmatpush.bf16.msra.mxu0 %v2054_v24  ;;  %2718 = vmatpush.bf16.msra.mxu1 %v2054_v24  ;;  %112 = vst [vmem:[#allocation2 + $0xc] sm:$0xf] %v96_v25  ;;  %v2046_v33 = vor.u32 %v2583_v32, %v2045_v31  ;;  %v2041_v35 = vld [vmem:[#allocation2 + $0x34] sm:$0xf]  ;;  %v2575_v56 = vld [vmem:[#allocation3 + $0x20] sm:$0xff]  ;;  %v138_v59 = vld [vmem:[%s3212_s2 + $0x58] sm:$0xff] }
  0x23   :  { %2719 = vmatpush.bf16.msra.mxu2 %v2054_v24  ;;  %2720 = vmatpush.bf16.msra.mxu3 %v2054_v24  ;;  %v2582_v36 = vld [vmem:[#allocation2 + $0x38] sm:$0xf0]  ;;  %v2577_v57 = vld [vmem:[#allocation3 + $0x30] sm:$0xff]  ;;  %v135_v58 = vld [vmem:[%s3212_s2 + $0x40] sm:$0xff] }
  0x24   :  { %352 = vperm.xlu0 %2746, %v133_v29   ;;  %v2042_v38 = vor.u32 %v2582_v36, %v2041_v35  ;;  %v2037_v39 = vld [vmem:[#allocation2 + $0x24] sm:$0xf]  ;;  %v2572_v60 = vld [vmem:[#allocation3 + $0x8] sm:$0xff]  ;;  %v2574_v61 = vld [vmem:[#allocation3 + $0x18] sm:$0xff] }
  0x25   :  { %v2581_v40 = vld [vmem:[#allocation2 + $0x28] sm:$0xf0]  ;;  %v2578_v63 = vld [vmem:[#allocation3 + $0x38] sm:$0xff]  ;;  %v141_v0 = vld [vmem:[%s3212_s2 + $0x70] sm:$0xff] }
  0x26   :  { %273 = vmatpush.bf16.msra.mxu0 %v2050_v30  ;;  %2721 = vmatpush.bf16.msra.mxu1 %v2050_v30  ;;  %v2038_v41 = vor.u32 %v2581_v40, %v2037_v39  ;;  %v2033_v44 = vld [vmem:[#allocation2 + $0x14] sm:$0xf]  ;;  %v2576_v62 = vld [vmem:[#allocation3 + $0x28] sm:$0xff]  ;;  %v2618_v1 = vld [vmem:[%s3213_s3 + $0x78] sm:$0xff] }
  0x27   :  { %2722 = vmatpush.bf16.msra.mxu2 %v2050_v30  ;;  %2723 = vmatpush.bf16.msra.mxu3 %v2050_v30  ;;  %v2580_v45 = vld [vmem:[#allocation2 + $0x18] sm:$0xf0]  ;;  %v2617_v2 = vld [vmem:[%s3213_s3 + $0x70] sm:$0xff]  ;;  %v2616_v3 = vld [vmem:[%s3213_s3 + $0x68] sm:$0xff] }
  0x28   :  { %357 = vperm.xlu1 %2747, %v134_v34   ;;  %v2034_v47 = vor.u32 %v2580_v45, %v2033_v44  ;;  %v2029_v48 = vld [vmem:[#allocation2 + $0x4] sm:$0xf]  ;;  %347 = vperm.xlu2 %2748, %v132_v50   ;;  %v2610_v4 = vld [vmem:[%s3213_s3 + $0x38] sm:$0xff]  ;;  %v2609_v6 = vld [vmem:[%s3213_s3 + $0x30] sm:$0xff] }
  0x29   :  { %v2579_v49 = vld [vmem:[#allocation2 + $0x8] sm:$0xf0]  ;;  %v2615_v5 = vld [vmem:[%s3213_s3 + $0x60] sm:$0xff]  ;;  %v2614_v7 = vld [vmem:[%s3213_s3 + $0x58] sm:$0xff] }
  0x2a   :  { %274 = vmatpush.bf16.msra.mxu0 %v2046_v33  ;;  %2724 = vmatpush.bf16.msra.mxu1 %v2046_v33  ;;  %v2030_v51 = vor.u32 %v2579_v49, %v2029_v48  ;;  %v2608_v9 = vld [vmem:[%s3213_s3 + $0x28] sm:$0xff]  ;;  %v2613_v10 = vld [vmem:[%s3213_s3 + $0x50] sm:$0xff]  ;;  %v2607_v11 = vld [vmem:[%s3213_s3 + $0x20] sm:$0xff] }
  0x2b   :  { %2725 = vmatpush.bf16.msra.mxu2 %v2046_v33  ;;  %2726 = vmatpush.bf16.msra.mxu3 %v2046_v33  ;;  %v2612_v12 = vld [vmem:[%s3213_s3 + $0x48] sm:$0xff]  ;;  %v2606_v14 = vld [vmem:[%s3213_s3 + $0x18] sm:$0xff]  ;;  %v2611_v15 = vld [vmem:[%s3213_s3 + $0x40] sm:$0xff] }
  0x2c   :  { %367 = vperm.xlu0 %2746, %v136_v37   ;;  %v2587_v17 = vld [vmem:[#allocation2 + $0x4] sm:$0xf]  ;;  %v2063_v18 = vld [vmem:[#allocation2 + $0x8] sm:$0xf0]  ;;  %v2605_v20 = vld [vmem:[%s3213_s3 + $0x10] sm:$0xff] }
  0x2d   :  { %v2066_v19 = vor.u32 %v2587_v17, %v2063_v18  ;;  %v2604_v23 = vld [vmem:[%s3213_s3 + $0x8] sm:$0xff]  ;;  %v2603_v25 = vld [vmem:[%s3213_s3] sm:$0xff]  ;;  %v2589_v28 = vld [vmem:[#allocation2 + $0x14] sm:$0xf] }
  0x2e   :  { %275 = vmatpush.bf16.msra.mxu0 %v2042_v38  ;;  %2727 = vmatpush.bf16.msra.mxu1 %v2042_v38  ;;  %v2071_v29 = vld [vmem:[#allocation2 + $0x18] sm:$0xf0]  ;;  %v2591_v43 = vld [vmem:[#allocation2 + $0x24] sm:$0xf]  ;;  %v2079_v44 = vld [vmem:[#allocation2 + $0x28] sm:$0xf0] }
  0x2f   :  { %2728 = vmatpush.bf16.msra.mxu2 %v2042_v38  ;;  %2729 = vmatpush.bf16.msra.mxu3 %v2042_v38  ;;  %v2074_v30 = vor.u32 %v2589_v28, %v2071_v29 }
  0x30   :  { %372 = vperm.xlu1 %2747, %v137_v42   ;;  %362 = vperm.xlu2 %2748, %v135_v58  }
  0x32   :  { %276 = vmatpush.bf16.msra.mxu0 %v2038_v41  ;;  %2730 = vmatpush.bf16.msra.mxu1 %v2038_v41 }
  0x33   :  { %2731 = vmatpush.bf16.msra.mxu2 %v2038_v41  ;;  %2732 = vmatpush.bf16.msra.mxu3 %v2038_v41 }
  0x34   :  { %382 = vperm.xlu0 %2746, %v139_v46  }
  0x36   :  { %277 = vmatpush.bf16.msra.mxu0 %v2034_v47  ;;  %2733 = vmatpush.bf16.msra.mxu1 %v2034_v47 }
  0x37   :  { %2734 = vmatpush.bf16.msra.mxu2 %v2034_v47  ;;  %2735 = vmatpush.bf16.msra.mxu3 %v2034_v47 }
  0x38   :  { %387 = vperm.xlu1 %2747, %v140_v52   ;;  %377 = vperm.xlu2 %2748, %v138_v59  }
  0x3a   :  { %278 = vmatpush.bf16.msra.mxu0 %v2030_v51  ;;  %2736 = vmatpush.bf16.msra.mxu1 %v2030_v51 }
  0x3b   :  { %2737 = vmatpush.bf16.msra.mxu2 %v2030_v51  ;;  %2738 = vmatpush.bf16.msra.mxu3 %v2030_v51  ;;  %v2082_v51 = vor.u32 %v2591_v43, %v2079_v44 }
  0x3c   :  { %397 = vperm.xlu0 %2746, %v142_v55  }
  0x3d   :  { %279 = vmatmul.bf16.vlgmr.msra.gmra.mxu0 %v2571_v53  ;;  %289 = vmatmul.bf16.vlgmr.msra.gmra.mxu1 %v2573_v54 }
  0x3e   :  { %299 = vmatmul.bf16.vlgmr.msra.gmra.mxu2 %v2575_v56  ;;  %309 = vmatmul.bf16.vlgmr.msra.gmra.mxu3 %v2577_v57 }
  0x3f   :  { %725 = vmatpush.bf16.msrb.mxu2 %v2618_v1  ;;  %676 = vmatpush.bf16.msrb.mxu1 %v2610_v4 }
  0x40   :  { %392 = vperm.xlu2 %2748, %v141_v0  }
  0x43   :  { %726 = vmatpush.bf16.msrb.mxu2 %v2617_v2  ;;  %677 = vmatpush.bf16.msrb.mxu1 %v2609_v6 }
  0x47   :  { %727 = vmatpush.bf16.msrb.mxu2 %v2616_v3  ;;  %678 = vmatpush.bf16.msrb.mxu1 %v2608_v9 }
  0x4b   :  { %728 = vmatpush.bf16.msrb.mxu2 %v2615_v5  ;;  %679 = vmatpush.bf16.msrb.mxu1 %v2607_v11 }
  0x4d   :  { %284 = vmatmul.bf16.gmra.mxu0 %v2572_v60  ;;  %294 = vmatmul.bf16.gmra.mxu1 %v2574_v61 }
  0x4e   :  { %304 = vmatmul.bf16.gmra.mxu2 %v2576_v62  ;;  %314 = vmatmul.bf16.gmra.mxu3 %v2578_v63 }
  0x4f   :  { %729 = vmatpush.bf16.msrb.mxu2 %v2614_v7  ;;  %680 = vmatpush.bf16.msrb.mxu1 %v2606_v14  ;;  %v2593_v14 = vld [vmem:[#allocation2 + $0x34] sm:$0xf] }
  0x53   :  { %730 = vmatpush.bf16.msrb.mxu2 %v2613_v10  ;;  %681 = vmatpush.bf16.msrb.mxu1 %v2605_v20 }
  0x57   :  { %731 = vmatpush.bf16.msrb.mxu2 %v2612_v12  ;;  %682 = vmatpush.bf16.msrb.mxu1 %v2604_v23 }
  0x5b   :  { %732 = vmatpush.bf16.msrb.mxu2 %v2611_v15  ;;  %683 = vmatpush.bf16.msrb.mxu1 %v2603_v25  ;;  %v2087_v15 = vld [vmem:[#allocation2 + $0x38] sm:$0xf0] }
  0x5c   :  { %v2090_v28 = vor.u32 %v2593_v14, %v2087_v15  ;;  %v2665_v15 = vld [vmem:[#allocation7 + $0x70] sm:$0xff] }
  0x5e   :  { %733 = vmatmul.bf16.vlgmr.msrb.gmra.mxu2 %v2066_v19 }
  0x6e   :  { %738 = vmatmul.bf16.gmra.mxu2 %v2074_v30 }
  0x7a   :  { %v3019_v21 = vpop.permute.xlu2 %342 }
  0x7e   :  { %743 = vmatmul.bf16.gmra.mxu2 %v2082_v51 }
  0x82   :  { %v3031_v26 = vpop.permute.xlu2 %347 }
  0x86   :  { %v2992_v8 = vpop.permute.xlu0 %322 }
  0x89   :  { %v3006_v13 = vpop.permute.xlu1 %332 }
  0x8a   :  { %v3039_v36 = vpop.permute.xlu2 %362 }
  0x8e   :  { %v3014_v16 = vpop.permute.xlu0 %327  ;;  %748 = vmatmul.bf16.gmra.mxu2 %v2090_v28 }
  0x92   :  { %v3021_v22 = vpop.permute.xlu1 %337  ;;  %v3049_v56 = vpop.permute.xlu2 %377 }
  0x96   :  { %v3026_v24 = vpop.permute.xlu0 %352 }
  0x9a   :  { %v3033_v27 = vpop.permute.xlu1 %357  ;;  %v3057_v10 = vpop.permute.xlu2 %392 }
  0x9e   :  { %v3035_v31 = vpop.permute.xlu0 %367 }
  0xa2   :  { %v3041_v39 = vpop.permute.xlu1 %372 }
  0xa6   :  { %v3043_v40 = vpop.permute.xlu0 %382 }
  0xaa   :  { %v3051_v57 = vpop.permute.xlu1 %387 }
  0xba   :  { %v280_v32 = vpop.f32.mrf.mxu0  ;;  %v290_v33 = vpop.f32.mrf.mxu1 }
  0xbb   :  { %v400_v34 = vmul.f32 %v2992_v8, %v280_v32  ;;  %v404_v35 = vmul.f32 %v3019_v21, %v290_v33 }
  0xbd   :  { %v416_v37 = vpack.c.bf16 %v400_v34, %v400_v34  ;;  %v420_v38 = vpack.c.bf16 %v404_v35, %v404_v35  ;;  %v3063_v34 = vpop.permute.xlu0 %397 }
  0xbf   :  { %432 = vst [vmem:[#allocation2] sm:$0xf] %v416_v37 }
  0xc0   :  { %436 = vst [vmem:[#allocation2 + $0x20] sm:$0xf] %v420_v38 }
  0xc1   :  { %v300_v41 = vpop.f32.mrf.mxu2  ;;  %v310_v42 = vpop.f32.mrf.mxu3 }
  0xc2   :  { %v412_v45 = vmul.f32 %v3043_v40, %v310_v42  ;;  %v282_v46 = vpop.f32.mrf.mxu0  ;;  %v292_v47 = vpop.f32.mrf.mxu1  ;;  %v408_v48 = vmul.f32 %v3039_v36, %v300_v41 }
  0xc3   :  { %v401_v49 = vmul.f32 %v3014_v16, %v282_v46  ;;  %v405_v50 = vmul.f32 %v3031_v26, %v292_v47  ;;  %v2595_v47 = vld [vmem:[#allocation2 + $0x44] sm:$0xf] }
  0xc4   :  { %v428_v52 = vpack.c.bf16 %v412_v45, %v412_v45  ;;  %v424_v55 = vpack.c.bf16 %v408_v48, %v408_v48  ;;  %v2095_v48 = vld [vmem:[#allocation2 + $0x48] sm:$0xf0] }
  0xc5   :  { %v417_v53 = vpack.c.bf16 %v401_v49, %v401_v49  ;;  %v421_v54 = vpack.c.bf16 %v405_v50, %v405_v50  ;;  %v2098_v49 = vor.u32 %v2595_v47, %v2095_v48 }
  0xc6   :  { %444 = vst [vmem:[#allocation2 + $0x60] sm:$0xf] %v428_v52  ;;  %v2061_v6 = vld [vmem:[#allocation2] sm:$0xf] }
  0xc7   :  { %433 = vst [vmem:[#allocation2 + $0x8] sm:$0xf] %v417_v53  ;;  %753 = vmatmul.bf16.gmra.mxu2 %v2098_v49  ;;  %v2077_v50 = vld [vmem:[#allocation2 + $0x20] sm:$0xf]  ;;  %v2597_v53 = vld [vmem:[#allocation2 + $0x54] sm:$0xf] }
  0xc8   :  { %437 = vst [vmem:[#allocation2 + $0x28] sm:$0xf] %v421_v54  ;;  %v2103_v54 = vld [vmem:[#allocation2 + $0x58] sm:$0xf0] }
  0xc9   :  { %440 = vst [vmem:[#allocation2 + $0x40] sm:$0xf] %v424_v55  ;;  %v302_v58 = vpop.f32.mrf.mxu2  ;;  %v312_v59 = vpop.f32.mrf.mxu3  ;;  %v2106_v55 = vor.u32 %v2597_v53, %v2103_v54 }
  0xca   :  { %v409_v60 = vmul.f32 %v3035_v31, %v302_v58  ;;  %v413_v61 = vmul.f32 %v3051_v57, %v312_v59  ;;  %v285_v62 = vpop.f32.mrf.mxu0  ;;  %v295_v63 = vpop.f32.mrf.mxu1 }
  0xcb   :  { %v402_v0 = vmul.f32 %v3006_v13, %v285_v62  ;;  %v406_v1 = vmul.f32 %v3026_v24, %v295_v63  ;;  %v2111_v62 = vld [vmem:[#allocation2 + $0x68] sm:$0xf0] }
  0xcc   :  { %v425_v2 = vpack.c.bf16 %v409_v60, %v409_v60  ;;  %v429_v3 = vpack.c.bf16 %v413_v61, %v413_v61  ;;  %v2599_v61 = vld [vmem:[#allocation2 + $0x64] sm:$0xf] }
  0xcd   :  { %v418_v4 = vpack.c.bf16 %v402_v0, %v402_v0  ;;  %v422_v5 = vpack.c.bf16 %v406_v1, %v406_v1  ;;  %v2114_v63 = vor.u32 %v2599_v61, %v2111_v62  ;;  %v2109_v14 = vld [vmem:[#allocation2 + $0x60] sm:$0xf] }
  0xce   :  { %441 = vst [vmem:[#allocation2 + $0x48] sm:$0xf] %v425_v2  ;;  %v2588_v7 = vld [vmem:[#allocation2 + $0x4] sm:$0xf0] }
  0xcf   :  { %445 = vst [vmem:[#allocation2 + $0x68] sm:$0xf] %v429_v3  ;;  %v2062_v9 = vor.u32 %v2588_v7, %v2061_v6  ;;  %v2592_v51 = vld [vmem:[#allocation2 + $0x24] sm:$0xf0]  ;;  %v2601_v3 = vld [vmem:[#allocation2 + $0x74] sm:$0xf] }
  0xd0   :  { %434 = vst [vmem:[#allocation2 + $0x10] sm:$0xf] %v418_v4  ;;  %v2078_v52 = vor.u32 %v2592_v51, %v2077_v50  ;;  %v2093_v0 = vld [vmem:[#allocation2 + $0x40] sm:$0xf]  ;;  %v2119_v4 = vld [vmem:[#allocation2 + $0x78] sm:$0xf0] }
  0xd1   :  { %438 = vst [vmem:[#allocation2 + $0x30] sm:$0xf] %v422_v5  ;;  %v305_v11 = vpop.f32.mrf.mxu2  ;;  %v315_v12 = vpop.f32.mrf.mxu3  ;;  %684 = vmatmul.bf16.vlgmr.msrb.gmra.mxu1 %v2062_v9  ;;  %v2122_v5 = vor.u32 %v2601_v3, %v2119_v4 }
  0xd2   :  { %v410_v17 = vmul.f32 %v3041_v39, %v305_v11  ;;  %v287_v18 = vpop.f32.mrf.mxu0  ;;  %v297_v19 = vpop.f32.mrf.mxu1  ;;  %v414_v20 = vmul.f32 %v3057_v10, %v315_v12  ;;  %v2666_v11 = vld [vmem:[#allocation7 + $0x78] sm:$0xff] }
  0xd3   :  { %v403_v23 = vmul.f32 %v3021_v22, %v287_v18  ;;  %v407_v25 = vmul.f32 %v3033_v27, %v297_v19  ;;  %1324 = vmatpush.bf16.msra.mxu1 %v2666_v11  ;;  %v2664_v19 = vld [vmem:[#allocation7 + $0x68] sm:$0xff] }
  0xd4   :  { %v426_v29 = vpack.c.bf16 %v410_v17, %v410_v17  ;;  %v430_v33 = vpack.c.bf16 %v414_v20, %v414_v20  ;;  %v2663_v20 = vld [vmem:[#allocation7 + $0x60] sm:$0xff] }
  0xd5   :  { %v419_v30 = vpack.c.bf16 %v403_v23, %v403_v23  ;;  %v423_v32 = vpack.c.bf16 %v407_v25, %v407_v25  ;;  %v2596_v1 = vld [vmem:[#allocation2 + $0x44] sm:$0xf0]  ;;  %v2662_v23 = vld [vmem:[#allocation7 + $0x58] sm:$0xff] }
  0xd6   :  { %442 = vst [vmem:[#allocation2 + $0x50] sm:$0xf] %v426_v29  ;;  %v2094_v2 = vor.u32 %v2596_v1, %v2093_v0  ;;  %v2600_v12 = vld [vmem:[#allocation2 + $0x64] sm:$0xf0] }
  0xd7   :  { %435 = vst [vmem:[#allocation2 + $0x18] sm:$0xf] %v419_v30  ;;  %v2069_v44 = vld [vmem:[#allocation2 + $0x10] sm:$0xf]  ;;  %758 = vmatmul.bf16.gmra.mxu2 %v2106_v55  ;;  %v2110_v17 = vor.u32 %v2600_v12, %v2109_v14  ;;  %1325 = vmatpush.bf16.msra.mxu1 %v2665_v15 }
  0xd8   :  { %439 = vst [vmem:[#allocation2 + $0x38] sm:$0xf] %v423_v32  ;;  %v2085_v59 = vld [vmem:[#allocation2 + $0x30] sm:$0xf] }
  0xd9   :  { %446 = vst [vmem:[#allocation2 + $0x70] sm:$0xf] %v430_v33  ;;  %v307_v35 = vpop.f32.mrf.mxu2  ;;  %v317_v37 = vpop.f32.mrf.mxu3  ;;  %v2661_v30 = vld [vmem:[#allocation7 + $0x50] sm:$0xff]  ;;  %v2660_v33 = vld [vmem:[#allocation7 + $0x48] sm:$0xff] }
  0xda   :  { %v411_v38 = vmul.f32 %v3049_v56, %v307_v35  ;;  %v415_v41 = vmul.f32 %v3063_v34, %v317_v37  ;;  %v2659_v37 = vld [vmem:[#allocation7 + $0x40] sm:$0xff] }
  0xdb   :  { %1326 = vmatpush.bf16.msra.mxu1 %v2664_v19 }
  0xdc   :  { %v427_v42 = vpack.c.bf16 %v411_v38, %v411_v38  ;;  %v431_v43 = vpack.c.bf16 %v415_v41, %v415_v41  ;;  %v3070_v38 = vld [vmem:[%s3216_s6] ss:$0 sm:$0xff] }
  0xdd   :  { %v2101_v7 = vld [vmem:[#allocation2 + $0x50] sm:$0xf] }
  0xde   :  { %443 = vst [vmem:[#allocation2 + $0x58] sm:$0xf] %v427_v42  ;;  %v2590_v45 = vld [vmem:[#allocation2 + $0x14] sm:$0xf0] }
  0xdf   :  { %447 = vst [vmem:[#allocation2 + $0x78] sm:$0xf] %v431_v43  ;;  %v2070_v46 = vor.u32 %v2590_v45, %v2069_v44  ;;  %v2594_v58 = vld [vmem:[#allocation2 + $0x34] sm:$0xf0]  ;;  %1327 = vmatpush.bf16.msra.mxu1 %v2663_v20 }
  0xe0   :  { %v2086_v60 = vor.u32 %v2594_v58, %v2085_v59  ;;  %v2117_v25 = vld [vmem:[#allocation2 + $0x70] sm:$0xf] }
  0xe1   :  { %689 = vmatmul.bf16.gmra.mxu1 %v2070_v46  ;;  %v734_v18 = vpop.f32.mrf.mxu2 }
  0xe3   :  { %1328 = vmatpush.bf16.msra.mxu1 %v2662_v23 }
  0xe5   :  { %v2598_v6 = vld [vmem:[#allocation2 + $0x54] sm:$0xf0] }
  0xe6   :  { %v2102_v9 = vor.u32 %v2598_v6, %v2101_v7  ;;  %v2602_v28 = vld [vmem:[#allocation2 + $0x74] sm:$0xf0] }
  0xe7   :  { %763 = vmatmul.bf16.gmra.mxu2 %v2114_v63  ;;  %v2118_v32 = vor.u32 %v2602_v28, %v2117_v25  ;;  %1329 = vmatpush.bf16.msra.mxu1 %v2661_v30 }
  0xe9   :  { %v736_v29 = vpop.f32.mrf.mxu2 }
  0xeb   :  { %1330 = vmatpush.bf16.msra.mxu1 %v2660_v33 }
  0xef   :  { %1331 = vmatpush.bf16.msra.mxu1 %v2659_v37 }
  0xf1   :  { %694 = vmatmul.bf16.gmra.mxu1 %v2078_v52  ;;  %v739_v35 = vpop.f32.mrf.mxu2 }
  0xf7   :  { %768 = vmatmul.bf16.gmra.mxu2 %v2122_v5 }
  0xf9   :  { %v741_v43 = vpop.f32.mrf.mxu2 }
 0x101   :  { %699 = vmatmul.bf16.gmra.mxu1 %v2086_v60  ;;  %v744_v50 = vpop.f32.mrf.mxu2 }
 0x109   :  { %v746_v59 = vpop.f32.mrf.mxu2 }
 0x111   :  { %704 = vmatmul.bf16.gmra.mxu1 %v2094_v2  ;;  %v749_v6 = vpop.f32.mrf.mxu2 }
 0x119   :  { %v751_v20 = vpop.f32.mrf.mxu2 }
 0x121   :  { %709 = vmatmul.bf16.gmra.mxu1 %v2102_v9 }
 0x131   :  { %714 = vmatmul.bf16.gmra.mxu1 %v2110_v17 }
 0x141   :  { %719 = vmatmul.bf16.gmra.mxu1 %v2118_v32 }
 0x14a   :  { %v754_v33 = vpop.f32.mrf.mxu2 }
 0x14e   :  { %v685_v41 = vpop.f32.mrf.mxu1 }
 0x14f   :  { %v686_v42 = vadd.f32 %v3070_v38, %v685_v41 }
 0x151   :  { %v735_v44 = vadd.f32 %v734_v18, %v686_v42 }
 0x153   :  { %v774_v45 = vmax.f32 %v735_v44, 0.0 }
 0x155   :  { %v790_v46 = vpack.c.bf16 %v774_v45, %v774_v45 }
 0x156   :  { %v687_v47 = vpop.f32.mrf.mxu1 }
 0x157   :  { %806 = vst [vmem:[#allocation2 + $0x4] sm:$0xf] %v790_v46  ;;  %v688_v48 = vadd.f32 %v3070_v38, %v687_v47 }
 0x159   :  { %v737_v49 = vadd.f32 %v736_v29, %v688_v48  ;;  %v756_v48 = vpop.f32.mrf.mxu2 }
 0x15b   :  { %v775_v51 = vmax.f32 %v737_v49, 0.0 }
 0x15d   :  { %v791_v52 = vpack.c.bf16 %v775_v51, %v775_v51 }
 0x15e   :  { %v690_v53 = vpop.f32.mrf.mxu1  ;;  %v2635_v62 = vld [vmem:[#allocation2 + $0x4] sm:$0xf] }
 0x15f   :  { %807 = vst [vmem:[#allocation2 + $0xc] sm:$0xf] %v791_v52  ;;  %v691_v54 = vadd.f32 %v3070_v38, %v690_v53 }
 0x161   :  { %v740_v55 = vadd.f32 %v739_v35, %v691_v54 }
 0x163   :  { %v776_v58 = vmax.f32 %v740_v55, 0.0 }
 0x165   :  { %v792_v60 = vpack.c.bf16 %v776_v58, %v776_v58  ;;  %v759_v58 = vpop.f32.mrf.mxu2 }
 0x166   :  { %v692_v61 = vpop.f32.mrf.mxu1  ;;  %v2255_v63 = vld [vmem:[#allocation2 + $0x8] sm:$0xf0] }
 0x167   :  { %808 = vst [vmem:[#allocation2 + $0x14] sm:$0xf] %v792_v60  ;;  %v693_v0 = vadd.f32 %v3070_v38, %v692_v61  ;;  %v2258_v1 = vor.u32 %v2635_v62, %v2255_v63 }
 0x169   :  { %v742_v2 = vadd.f32 %v741_v43, %v693_v0  ;;  %1332 = vmatmul.bf16.vlgmr.msra.gmra.mxu1 %v2258_v1 }
 0x16b   :  { %v777_v3 = vmax.f32 %v742_v2, 0.0 }
 0x16d   :  { %v793_v4 = vpack.c.bf16 %v777_v3, %v777_v3 }
 0x16e   :  { %v695_v5 = vpop.f32.mrf.mxu1  ;;  %v2637_v15 = vld [vmem:[#allocation2 + $0x14] sm:$0xf] }
 0x16f   :  { %809 = vst [vmem:[#allocation2 + $0x1c] sm:$0xf] %v793_v4  ;;  %v696_v7 = vadd.f32 %v3070_v38, %v695_v5  ;;  %v761_v4 = vpop.f32.mrf.mxu2 }
 0x171   :  { %v745_v9 = vadd.f32 %v744_v50, %v696_v7 }
 0x173   :  { %v778_v11 = vmax.f32 %v745_v9, 0.0 }
 0x175   :  { %v794_v12 = vpack.c.bf16 %v778_v11, %v778_v11 }
 0x176   :  { %v697_v14 = vpop.f32.mrf.mxu1  ;;  %v2263_v17 = vld [vmem:[#allocation2 + $0x18] sm:$0xf0] }
 0x177   :  { %810 = vst [vmem:[#allocation2 + $0x24] sm:$0xf] %v794_v12  ;;  %v698_v18 = vadd.f32 %v3070_v38, %v697_v14  ;;  %v2266_v19 = vor.u32 %v2637_v15, %v2263_v17 }
 0x179   :  { %v747_v23 = vadd.f32 %v746_v59, %v698_v18  ;;  %1337 = vmatmul.bf16.gmra.mxu1 %v2266_v19  ;;  %v764_v18 = vpop.f32.mrf.mxu2 }
 0x17b   :  { %v779_v25 = vmax.f32 %v747_v23, 0.0 }
 0x17d   :  { %v795_v28 = vpack.c.bf16 %v779_v25, %v779_v25 }
 0x17e   :  { %v700_v29 = vpop.f32.mrf.mxu1  ;;  %v2639_v42 = vld [vmem:[#allocation2 + $0x24] sm:$0xf] }
 0x17f   :  { %811 = vst [vmem:[#allocation2 + $0x2c] sm:$0xf] %v795_v28  ;;  %v701_v30 = vadd.f32 %v3070_v38, %v700_v29 }
 0x181   :  { %v750_v32 = vadd.f32 %v749_v6, %v701_v30  ;;  %v766_v30 = vpop.f32.mrf.mxu2 }
 0x183   :  { %v780_v35 = vmax.f32 %v750_v32, 0.0 }
 0x185   :  { %v796_v37 = vpack.c.bf16 %v780_v35, %v780_v35 }
 0x186   :  { %v702_v41 = vpop.f32.mrf.mxu1  ;;  %v2271_v43 = vld [vmem:[#allocation2 + $0x28] sm:$0xf0] }
 0x187   :  { %812 = vst [vmem:[#allocation2 + $0x34] sm:$0xf] %v796_v37  ;;  %v703_v44 = vadd.f32 %v3070_v38, %v702_v41  ;;  %v2274_v45 = vor.u32 %v2639_v42, %v2271_v43 }
 0x189   :  { %v752_v46 = vadd.f32 %v751_v20, %v703_v44  ;;  %1342 = vmatmul.bf16.gmra.mxu1 %v2274_v45 }
 0x18b   :  { %v781_v47 = vmax.f32 %v752_v46, 0.0  ;;  %v769_v46 = vpop.f32.mrf.mxu2 }
 0x18d   :  { %v797_v49 = vpack.c.bf16 %v781_v47, %v781_v47 }
 0x18e   :  { %v705_v50 = vpop.f32.mrf.mxu1  ;;  %v2641_v59 = vld [vmem:[#allocation2 + $0x34] sm:$0xf] }
 0x18f   :  { %813 = vst [vmem:[#allocation2 + $0x3c] sm:$0xf] %v797_v49  ;;  %v706_v51 = vadd.f32 %v3070_v38, %v705_v50 }
 0x191   :  { %v755_v52 = vadd.f32 %v754_v33, %v706_v51 }
 0x193   :  { %v782_v53 = vmax.f32 %v755_v52, 0.0 }
 0x195   :  { %v798_v54 = vpack.c.bf16 %v782_v53, %v782_v53 }
 0x196   :  { %v707_v55 = vpop.f32.mrf.mxu1  ;;  %v2279_v60 = vld [vmem:[#allocation2 + $0x38] sm:$0xf0] }
 0x197   :  { %814 = vst [vmem:[#allocation2 + $0x44] sm:$0xf] %v798_v54  ;;  %v708_v61 = vadd.f32 %v3070_v38, %v707_v55  ;;  %v2282_v62 = vor.u32 %v2641_v59, %v2279_v60  ;;  %v771_v59 = vpop.f32.mrf.mxu2 }
 0x199   :  { %v757_v63 = vadd.f32 %v756_v48, %v708_v61  ;;  %1347 = vmatmul.bf16.gmra.mxu1 %v2282_v62 }
 0x19b   :  { %v783_v0 = vmax.f32 %v757_v63, 0.0 }
 0x19d   :  { %v799_v1 = vpack.c.bf16 %v783_v0, %v783_v0 }
 0x19e   :  { %v710_v2 = vpop.f32.mrf.mxu1  ;;  %v2643_v11 = vld [vmem:[#allocation2 + $0x44] sm:$0xf] }
 0x19f   :  { %815 = vst [vmem:[#allocation2 + $0x4c] sm:$0xf] %v799_v1  ;;  %v711_v3 = vadd.f32 %v3070_v38, %v710_v2 }
 0x1a1   :  { %v760_v5 = vadd.f32 %v759_v58, %v711_v3 }
 0x1a3   :  { %v784_v6 = vmax.f32 %v760_v5, 0.0 }
 0x1a5   :  { %v800_v7 = vpack.c.bf16 %v784_v6, %v784_v6 }
 0x1a6   :  { %v712_v9 = vpop.f32.mrf.mxu1  ;;  %v2287_v12 = vld [vmem:[#allocation2 + $0x48] sm:$0xf0] }
 0x1a7   :  { %816 = vst [vmem:[#allocation2 + $0x54] sm:$0xf] %v800_v7  ;;  %v713_v14 = vadd.f32 %v3070_v38, %v712_v9  ;;  %v2290_v15 = vor.u32 %v2643_v11, %v2287_v12  ;;  %v2631_v12 = vld [vmem:[#allocation2 + $0x48] sm:$0xf0] }
 0x1a9   :  { %v762_v17 = vadd.f32 %v761_v4, %v713_v14  ;;  %1352 = vmatmul.bf16.gmra.mxu1 %v2290_v15  ;;  %v2237_v14 = vld [vmem:[#allocation2 + $0x44] sm:$0xf] }
 0x1aa   :  { %v2238_v15 = vor.u32 %v2631_v12, %v2237_v14 }
 0x1ab   :  { %v785_v19 = vmax.f32 %v762_v17, 0.0  ;;  %v2630_v17 = vld [vmem:[#allocation2 + $0x38] sm:$0xf0] }
 0x1ad   :  { %v801_v20 = vpack.c.bf16 %v785_v19, %v785_v19 }
 0x1ae   :  { %v715_v23 = vpop.f32.mrf.mxu1  ;;  %v2645_v35 = vld [vmem:[#allocation2 + $0x54] sm:$0xf] }
 0x1af   :  { %817 = vst [vmem:[#allocation2 + $0x5c] sm:$0xf] %v801_v20  ;;  %v716_v25 = vadd.f32 %v3070_v38, %v715_v23  ;;  %v2629_v20 = vld [vmem:[#allocation2 + $0x28] sm:$0xf0]  ;;  %v2229_v23 = vld [vmem:[#allocation2 + $0x24] sm:$0xf] }
 0x1b1   :  { %v765_v28 = vadd.f32 %v764_v18, %v716_v25  ;;  %v2233_v18 = vld [vmem:[#allocation2 + $0x34] sm:$0xf]  ;;  %v2230_v25 = vor.u32 %v2629_v20, %v2229_v23 }
 0x1b2   :  { %v2234_v19 = vor.u32 %v2630_v17, %v2233_v18 }
 0x1b3   :  { %v786_v29 = vmax.f32 %v765_v28, 0.0  ;;  %v2628_v28 = vld [vmem:[#allocation2 + $0x18] sm:$0xf0] }
 0x1b5   :  { %v802_v32 = vpack.c.bf16 %v786_v29, %v786_v29  ;;  %v2225_v29 = vld [vmem:[#allocation2 + $0x14] sm:$0xf] }
 0x1b6   :  { %v717_v33 = vpop.f32.mrf.mxu1  ;;  %v2295_v37 = vld [vmem:[#allocation2 + $0x58] sm:$0xf0] }
 0x1b7   :  { %818 = vst [vmem:[#allocation2 + $0x64] sm:$0xf] %v802_v32  ;;  %v718_v41 = vadd.f32 %v3070_v38, %v717_v33  ;;  %v2298_v42 = vor.u32 %v2645_v35, %v2295_v37  ;;  %v2632_v9 = vld [vmem:[#allocation2 + $0x58] sm:$0xf0]  ;;  %v2627_v32 = vld [vmem:[#allocation2 + $0x8] sm:$0xf0] }
 0x1b8   :  { %v2221_v33 = vld [vmem:[#allocation2 + $0x4] sm:$0xf] }
 0x1b9   :  { %v767_v43 = vadd.f32 %v766_v30, %v718_v41  ;;  %1357 = vmatmul.bf16.gmra.mxu1 %v2298_v42  ;;  %v2226_v30 = vor.u32 %v2628_v28, %v2225_v29  ;;  %v2222_v35 = vor.u32 %v2627_v32, %v2221_v33  ;;  %v2619_v37 = vld [vmem:[#allocation3] sm:$0xff]  ;;  %v2620_v41 = vld [vmem:[#allocation3 + $0x8] sm:$0xff]  ;;  %v2621_v42 = vld [vmem:[#allocation3 + $0x10] sm:$0xff] }
 0x1bb   :  { %v787_v44 = vmax.f32 %v767_v43, 0.0  ;;  %v2622_v43 = vld [vmem:[#allocation3 + $0x18] sm:$0xff] }
 0x1bd   :  { %v803_v45 = vpack.c.bf16 %v787_v44, %v787_v44  ;;  %v2623_v44 = vld [vmem:[#allocation3 + $0x20] sm:$0xff] }
 0x1be   :  { %v720_v47 = vpop.f32.mrf.mxu1  ;;  %v2647_v53 = vld [vmem:[#allocation2 + $0x64] sm:$0xf] }
 0x1bf   :  { %819 = vst [vmem:[#allocation2 + $0x6c] sm:$0xf] %v803_v45  ;;  %v721_v48 = vadd.f32 %v3070_v38, %v720_v47  ;;  %v2245_v6 = vld [vmem:[#allocation2 + $0x64] sm:$0xf]  ;;  %v2624_v45 = vld [vmem:[#allocation3 + $0x28] sm:$0xff]  ;;  %v2657_v47 = vld [vmem:[#allocation7 + $0x30] sm:$0xff] }
 0x1c1   :  { %v770_v49 = vadd.f32 %v769_v46, %v721_v48  ;;  %v2658_v46 = vld [vmem:[#allocation7 + $0x38] sm:$0xff]  ;;  %v2625_v48 = vld [vmem:[#allocation3 + $0x30] sm:$0xff] }
 0x1c2   :  { %1275 = vmatpush.bf16.msrb.mxu0 %v2658_v46 }
 0x1c3   :  { %v788_v50 = vmax.f32 %v770_v49, 0.0  ;;  %v2656_v49 = vld [vmem:[#allocation7 + $0x28] sm:$0xff] }
 0x1c5   :  { %v804_v51 = vpack.c.bf16 %v788_v50, %v788_v50  ;;  %v2655_v50 = vld [vmem:[#allocation7 + $0x20] sm:$0xff] }
 0x1c6   :  { %v722_v52 = vpop.f32.mrf.mxu1  ;;  %v2303_v54 = vld [vmem:[#allocation2 + $0x68] sm:$0xf0]  ;;  %1276 = vmatpush.bf16.msrb.mxu0 %v2657_v47 }
 0x1c7   :  { %820 = vst [vmem:[#allocation2 + $0x74] sm:$0xf] %v804_v51  ;;  %v723_v55 = vadd.f32 %v3070_v38, %v722_v52  ;;  %v2306_v58 = vor.u32 %v2647_v53, %v2303_v54  ;;  %v2633_v5 = vld [vmem:[#allocation2 + $0x68] sm:$0xf0]  ;;  %v2241_v38 = vld [vmem:[#allocation2 + $0x54] sm:$0xf] }
 0x1c8   :  { %v2246_v7 = vor.u32 %v2633_v5, %v2245_v6  ;;  %v2242_v11 = vor.u32 %v2632_v9, %v2241_v38  ;;  %v2654_v51 = vld [vmem:[#allocation7 + $0x18] sm:$0xff]  ;;  %v2653_v53 = vld [vmem:[#allocation7 + $0x10] sm:$0xff]  ;;  %v2652_v54 = vld [vmem:[#allocation7 + $0x8] sm:$0xff] }
 0x1c9   :  { %v772_v60 = vadd.f32 %v771_v59, %v723_v55  ;;  %1362 = vmatmul.bf16.gmra.mxu1 %v2306_v58  ;;  %v2626_v52 = vld [vmem:[#allocation3 + $0x38] sm:$0xff]  ;;  %v2651_v55 = vld [vmem:[#allocation7] sm:$0xff] }
 0x1ca   :  { %1277 = vmatpush.bf16.msrb.mxu0 %v2656_v49 }
 0x1cb   :  { %v789_v61 = vmax.f32 %v772_v60, 0.0 }
 0x1cd   :  { %v805_v62 = vpack.c.bf16 %v789_v61, %v789_v61 }
 0x1ce   :  { %v2249_v63 = vld [vmem:[#allocation2 + $0x74] sm:$0xf]  ;;  %1278 = vmatpush.bf16.msrb.mxu0 %v2655_v50 }
 0x1cf   :  { %821 = vst [vmem:[#allocation2 + $0x7c] sm:$0xf] %v805_v62  ;;  %v2649_v1 = vld [vmem:[#allocation2 + $0x74] sm:$0xf] }
 0x1d2   :  { %1279 = vmatpush.bf16.msrb.mxu0 %v2654_v51 }
 0x1d6   :  { %v2634_v0 = vld [vmem:[#allocation2 + $0x78] sm:$0xf0]  ;;  %1280 = vmatpush.bf16.msrb.mxu0 %v2653_v53 }
 0x1d7   :  { %v2311_v2 = vld [vmem:[#allocation2 + $0x78] sm:$0xf0]  ;;  %v2250_v3 = vor.u32 %v2634_v0, %v2249_v63 }
 0x1d8   :  { %v2314_v4 = vor.u32 %v2649_v1, %v2311_v2 }
 0x1d9   :  { %950 = vmatpush.bf16.msrb.mxu3 %v2250_v3 }
 0x1da   :  { %1367 = vmatmul.bf16.gmra.mxu1 %v2314_v4  ;;  %1281 = vmatpush.bf16.msrb.mxu0 %v2652_v54 }
 0x1dd   :  { %951 = vmatpush.bf16.msrb.mxu3 %v2246_v7 }
 0x1de   :  { %1282 = vmatpush.bf16.msrb.mxu0 %v2651_v55 }
 0x1e1   :  { %952 = vmatpush.bf16.msrb.mxu3 %v2242_v11 }
 0x1e5   :  { %953 = vmatpush.bf16.msrb.mxu3 %v2238_v15 }
 0x1e9   :  { %954 = vmatpush.bf16.msrb.mxu3 %v2234_v19 }
 0x1ed   :  { %955 = vmatpush.bf16.msrb.mxu3 %v2230_v25 }
 0x1f1   :  { %956 = vmatpush.bf16.msrb.mxu3 %v2226_v30 }
 0x1f5   :  { %957 = vmatpush.bf16.msrb.mxu3 %v2222_v35 }
 0x1f8   :  { %958 = vmatmul.bf16.vlgmr.msrb.gmra.mxu3 %v2619_v37 }
 0x208   :  { %963 = vmatmul.bf16.gmra.mxu3 %v2620_v41 }
 0x218   :  { %968 = vmatmul.bf16.gmra.mxu3 %v2621_v42 }
 0x228   :  { %973 = vmatmul.bf16.gmra.mxu3 %v2622_v43 }
 0x238   :  { %978 = vmatmul.bf16.gmra.mxu3 %v2623_v44 }
 0x248   :  { %983 = vmatmul.bf16.gmra.mxu3 %v2624_v45 }
 0x258   :  { %988 = vmatmul.bf16.gmra.mxu3 %v2625_v48 }
 0x268   :  { %993 = vmatmul.bf16.gmra.mxu3 %v2626_v52 }
 0x27b   :  { %v959_v58 = vpop.f32.mrf.mxu3 }
 0x27c   :  { %v999_v59 = vmul.f32 %v959_v58, %v2992_v8 }
 0x27e   :  { %v1015_v60 = vpack.c.bf16 %v999_v59, %v999_v59 }
 0x280   :  { %1031 = vst [vmem:[#allocation2] sm:$0xf] %v1015_v60 }
 0x283   :  { %v961_v61 = vpop.f32.mrf.mxu3 }
 0x284   :  { %v1000_v62 = vmul.f32 %v961_v61, %v3014_v16 }
 0x286   :  { %v1016_v63 = vpack.c.bf16 %v1000_v62, %v1000_v62 }
 0x287   :  { %v2253_v3 = vld [vmem:[#allocation2] sm:$0xf] }
 0x288   :  { %1032 = vst [vmem:[#allocation2 + $0x8] sm:$0xf] %v1016_v63 }
 0x28b   :  { %v964_v0 = vpop.f32.mrf.mxu3 }
 0x28c   :  { %v1001_v1 = vmul.f32 %v964_v0, %v3006_v13 }
 0x28e   :  { %v1017_v2 = vpack.c.bf16 %v1001_v1, %v1001_v1 }
 0x28f   :  { %v2636_v4 = vld [vmem:[#allocation2 + $0x4] sm:$0xf0] }
 0x290   :  { %1033 = vst [vmem:[#allocation2 + $0x10] sm:$0xf] %v1017_v2  ;;  %v2254_v5 = vor.u32 %v2636_v4, %v2253_v3  ;;  %v2714_v3 = vld [vmem:[#allocation8 + $0x78] sm:$0xff] }
 0x291   :  { %1923 = vmatpush.bf16.msra.mxu0 %v2714_v3 }
 0x292   :  { %1283 = vmatmul.bf16.vlgmr.msrb.gmra.mxu0 %v2254_v5 }
 0x293   :  { %v966_v6 = vpop.f32.mrf.mxu3 }
 0x294   :  { %v1002_v7 = vmul.f32 %v966_v6, %v3021_v22 }
 0x296   :  { %v1018_v9 = vpack.c.bf16 %v1002_v7, %v1002_v7 }
 0x297   :  { %v2261_v14 = vld [vmem:[#allocation2 + $0x10] sm:$0xf] }
 0x298   :  { %1034 = vst [vmem:[#allocation2 + $0x18] sm:$0xf] %v1018_v9 }
 0x29b   :  { %v969_v38 = vpop.f32.mrf.mxu3 }
 0x29c   :  { %v1003_v11 = vmul.f32 %v969_v38, %v3019_v21 }
 0x29e   :  { %v1019_v12 = vpack.c.bf16 %v1003_v11, %v1003_v11 }
 0x29f   :  { %v2638_v15 = vld [vmem:[#allocation2 + $0x14] sm:$0xf0] }
 0x2a0   :  { %1035 = vst [vmem:[#allocation2 + $0x20] sm:$0xf] %v1019_v12  ;;  %v2262_v17 = vor.u32 %v2638_v15, %v2261_v14  ;;  %v2713_v14 = vld [vmem:[#allocation8 + $0x70] sm:$0xff] }
 0x2a1   :  { %1924 = vmatpush.bf16.msra.mxu0 %v2713_v14 }
 0x2a2   :  { %1288 = vmatmul.bf16.gmra.mxu0 %v2262_v17  ;;  %v1333_v17 = vpop.f32.mrf.mxu1 }
 0x2a3   :  { %v971_v18 = vpop.f32.mrf.mxu3 }
 0x2a4   :  { %v1004_v19 = vmul.f32 %v971_v18, %v3031_v26 }
 0x2a6   :  { %v1020_v20 = vpack.c.bf16 %v1004_v19, %v1004_v19  ;;  %v2712_v19 = vld [vmem:[#allocation8 + $0x68] sm:$0xff] }
 0x2a7   :  { %v2269_v29 = vld [vmem:[#allocation2 + $0x20] sm:$0xf]  ;;  %1925 = vmatpush.bf16.msra.mxu0 %v2712_v19 }
 0x2a8   :  { %1036 = vst [vmem:[#allocation2 + $0x28] sm:$0xf] %v1020_v20 }
 0x2ab   :  { %v974_v23 = vpop.f32.mrf.mxu3 }
 0x2ac   :  { %v1005_v25 = vmul.f32 %v974_v23, %v3026_v24 }
 0x2ae   :  { %v1021_v28 = vpack.c.bf16 %v1005_v25, %v1005_v25  ;;  %v2711_v25 = vld [vmem:[#allocation8 + $0x60] sm:$0xff] }
 0x2af   :  { %v2640_v30 = vld [vmem:[#allocation2 + $0x24] sm:$0xf0]  ;;  %1926 = vmatpush.bf16.msra.mxu0 %v2711_v25 }
 0x2b0   :  { %1037 = vst [vmem:[#allocation2 + $0x30] sm:$0xf] %v1021_v28  ;;  %v2270_v32 = vor.u32 %v2640_v30, %v2269_v29  ;;  %v2710_v28 = vld [vmem:[#allocation8 + $0x58] sm:$0xff]  ;;  %v1335_v29 = vpop.f32.mrf.mxu1 }
 0x2b2   :  { %1293 = vmatmul.bf16.gmra.mxu0 %v2270_v32 }
 0x2b3   :  { %v976_v33 = vpop.f32.mrf.mxu3  ;;  %1927 = vmatpush.bf16.msra.mxu0 %v2710_v28 }
 0x2b4   :  { %v1006_v35 = vmul.f32 %v976_v33, %v3033_v27  ;;  %v2709_v33 = vld [vmem:[#allocation8 + $0x50] sm:$0xff] }
 0x2b6   :  { %v1022_v37 = vpack.c.bf16 %v1006_v35, %v1006_v35 }
 0x2b7   :  { %v2277_v44 = vld [vmem:[#allocation2 + $0x30] sm:$0xf]  ;;  %1928 = vmatpush.bf16.msra.mxu0 %v2709_v33 }
 0x2b8   :  { %1038 = vst [vmem:[#allocation2 + $0x38] sm:$0xf] %v1022_v37  ;;  %v2708_v37 = vld [vmem:[#allocation8 + $0x48] sm:$0xff] }
 0x2bb   :  { %v979_v41 = vpop.f32.mrf.mxu3  ;;  %1929 = vmatpush.bf16.msra.mxu0 %v2708_v37 }
 0x2bc   :  { %v1007_v42 = vmul.f32 %v979_v41, %v3039_v36  ;;  %v1338_v41 = vpop.f32.mrf.mxu1 }
 0x2be   :  { %v1023_v43 = vpack.c.bf16 %v1007_v42, %v1007_v42  ;;  %v2707_v42 = vld [vmem:[#allocation8 + $0x40] sm:$0xff] }
 0x2bf   :  { %v2642_v45 = vld [vmem:[#allocation2 + $0x34] sm:$0xf0]  ;;  %1930 = vmatpush.bf16.msra.mxu0 %v2707_v42 }
 0x2c0   :  { %1039 = vst [vmem:[#allocation2 + $0x40] sm:$0xf] %v1023_v43  ;;  %v2278_v46 = vor.u32 %v2642_v45, %v2277_v44  ;;  %v3107_v43 = vld [vmem:[%s3217_s7] ss:$0 sm:$0xff] }
 0x2c2   :  { %1298 = vmatmul.bf16.gmra.mxu0 %v2278_v46 }
 0x2c3   :  { %v981_v47 = vpop.f32.mrf.mxu3 }
 0x2c4   :  { %v1008_v48 = vmul.f32 %v981_v47, %v3035_v31  ;;  %v1340_v46 = vpop.f32.mrf.mxu1 }
 0x2c6   :  { %v1024_v49 = vpack.c.bf16 %v1008_v48, %v1008_v48 }
 0x2c7   :  { %v2285_v53 = vld [vmem:[#allocation2 + $0x40] sm:$0xf] }
 0x2c8   :  { %1040 = vst [vmem:[#allocation2 + $0x48] sm:$0xf] %v1024_v49 }
 0x2cb   :  { %v984_v50 = vpop.f32.mrf.mxu3 }
 0x2cc   :  { %v1009_v51 = vmul.f32 %v984_v50, %v3041_v39 }
 0x2ce   :  { %v1025_v52 = vpack.c.bf16 %v1009_v51, %v1009_v51 }
 0x2cf   :  { %v2644_v54 = vld [vmem:[#allocation2 + $0x44] sm:$0xf0] }
 0x2d0   :  { %1041 = vst [vmem:[#allocation2 + $0x50] sm:$0xf] %v1025_v52  ;;  %v2286_v55 = vor.u32 %v2644_v54, %v2285_v53  ;;  %v1343_v53 = vpop.f32.mrf.mxu1 }
 0x2d2   :  { %1303 = vmatmul.bf16.gmra.mxu0 %v2286_v55 }
 0x2d3   :  { %v986_v58 = vpop.f32.mrf.mxu3 }
 0x2d4   :  { %v1010_v59 = vmul.f32 %v986_v58, %v3049_v56 }
 0x2d6   :  { %v1026_v60 = vpack.c.bf16 %v1010_v59, %v1010_v59 }
 0x2d7   :  { %v2293_v0 = vld [vmem:[#allocation2 + $0x50] sm:$0xf] }
 0x2d8   :  { %1042 = vst [vmem:[#allocation2 + $0x58] sm:$0xf] %v1026_v60 }
 0x2db   :  { %v989_v61 = vpop.f32.mrf.mxu3 }
 0x2dc   :  { %v1011_v62 = vmul.f32 %v989_v61, %v3043_v40 }
 0x2de   :  { %v1027_v63 = vpack.c.bf16 %v1011_v62, %v1011_v62  ;;  %v1345_v62 = vpop.f32.mrf.mxu1 }
 0x2df   :  { %v2646_v1 = vld [vmem:[#allocation2 + $0x54] sm:$0xf0] }
 0x2e0   :  { %1043 = vst [vmem:[#allocation2 + $0x60] sm:$0xf] %v1027_v63  ;;  %v2294_v2 = vor.u32 %v2646_v1, %v2293_v0 }
 0x2e2   :  { %1308 = vmatmul.bf16.gmra.mxu0 %v2294_v2 }
 0x2e3   :  { %v991_v4 = vpop.f32.mrf.mxu3 }
 0x2e4   :  { %v1012_v5 = vmul.f32 %v991_v4, %v3051_v57 }
 0x2e6   :  { %v1028_v6 = vpack.c.bf16 %v1012_v5, %v1012_v5 }
 0x2e7   :  { %v2301_v11 = vld [vmem:[#allocation2 + $0x60] sm:$0xf] }
 0x2e8   :  { %1044 = vst [vmem:[#allocation2 + $0x68] sm:$0xf] %v1028_v6 }
 0x2eb   :  { %v994_v7 = vpop.f32.mrf.mxu3 }
 0x2ec   :  { %v1013_v9 = vmul.f32 %v994_v7, %v3057_v10 }
 0x2ee   :  { %v1029_v38 = vpack.c.bf16 %v1013_v9, %v1013_v9  ;;  %v1348_v9 = vpop.f32.mrf.mxu1 }
 0x2ef   :  { %v2648_v12 = vld [vmem:[#allocation2 + $0x64] sm:$0xf0] }
 0x2f0   :  { %1045 = vst [vmem:[#allocation2 + $0x70] sm:$0xf] %v1029_v38  ;;  %v2302_v15 = vor.u32 %v2648_v12, %v2301_v11 }
 0x2f2   :  { %1313 = vmatmul.bf16.gmra.mxu0 %v2302_v15 }
 0x2f3   :  { %v996_v18 = vpop.f32.mrf.mxu3 }
 0x2f4   :  { %v1014_v20 = vmul.f32 %v996_v18, %v3063_v34 }
 0x2f6   :  { %v1030_v23 = vpack.c.bf16 %v1014_v20, %v1014_v20  ;;  %v1350_v25 = vpop.f32.mrf.mxu1 }
 0x2f7   :  { %v2309_v30 = vld [vmem:[#allocation2 + $0x70] sm:$0xf] }
 0x2f8   :  { %1046 = vst [vmem:[#allocation2 + $0x78] sm:$0xf] %v1030_v23 }
 0x2fe   :  { %v1353_v37 = vpop.f32.mrf.mxu1 }
 0x2ff   :  { %v2650_v32 = vld [vmem:[#allocation2 + $0x74] sm:$0xf0] }
 0x300   :  { %v2310_v35 = vor.u32 %v2650_v32, %v2309_v30 }
 0x302   :  { %1318 = vmatmul.bf16.gmra.mxu0 %v2310_v35 }
 0x30f   :  { %v1284_v44 = vpop.f32.mrf.mxu0 }
 0x310   :  { %v1285_v45 = vadd.f32 %v3107_v43, %v1284_v44 }
 0x312   :  { %v1334_v47 = vadd.f32 %v1333_v17, %v1285_v45 }
 0x314   :  { %v1373_v48 = vmax.f32 %v1334_v47, 0.0 }
 0x316   :  { %v1389_v49 = vpack.c.bf16 %v1373_v48, %v1373_v48 }
 0x317   :  { %v1286_v50 = vpop.f32.mrf.mxu0 }
 0x318   :  { %1405 = vst [vmem:[#allocation2 + $0x4] sm:$0xf] %v1389_v49  ;;  %v1287_v51 = vadd.f32 %v3107_v43, %v1286_v50 }
 0x31a   :  { %v1336_v52 = vadd.f32 %v1335_v29, %v1287_v51  ;;  %v1355_v51 = vpop.f32.mrf.mxu1 }
 0x31c   :  { %v1374_v54 = vmax.f32 %v1336_v52, 0.0 }
 0x31e   :  { %v1390_v55 = vpack.c.bf16 %v1374_v54, %v1374_v54 }
 0x31f   :  { %v1289_v58 = vpop.f32.mrf.mxu0  ;;  %v2683_v1 = vld [vmem:[#allocation2 + $0x4] sm:$0xf] }
 0x320   :  { %1406 = vst [vmem:[#allocation2 + $0xc] sm:$0xf] %v1390_v55  ;;  %v1290_v59 = vadd.f32 %v3107_v43, %v1289_v58 }
 0x322   :  { %v1339_v60 = vadd.f32 %v1338_v41, %v1290_v59 }
 0x324   :  { %v1375_v61 = vmax.f32 %v1339_v60, 0.0  ;;  %v1358_v60 = vpop.f32.mrf.mxu1 }
 0x326   :  { %v1391_v63 = vpack.c.bf16 %v1375_v61, %v1375_v61 }
 0x327   :  { %v1291_v0 = vpop.f32.mrf.mxu0  ;;  %v2447_v2 = vld [vmem:[#allocation2 + $0x8] sm:$0xf0] }
 0x328   :  { %1407 = vst [vmem:[#allocation2 + $0x14] sm:$0xf] %v1391_v63  ;;  %v1292_v3 = vadd.f32 %v3107_v43, %v1291_v0  ;;  %v2450_v4 = vor.u32 %v2683_v1, %v2447_v2 }
 0x32a   :  { %v1341_v5 = vadd.f32 %v1340_v46, %v1292_v3  ;;  %1931 = vmatmul.bf16.vlgmr.msra.gmra.mxu0 %v2450_v4 }
 0x32c   :  { %v1376_v6 = vmax.f32 %v1341_v5, 0.0 }
 0x32e   :  { %v1392_v7 = vpack.c.bf16 %v1376_v6, %v1376_v6 }
 0x32f   :  { %v1294_v38 = vpop.f32.mrf.mxu0  ;;  %v2685_v18 = vld [vmem:[#allocation2 + $0x14] sm:$0xf] }
 0x330   :  { %1408 = vst [vmem:[#allocation2 + $0x1c] sm:$0xf] %v1392_v7  ;;  %v1295_v11 = vadd.f32 %v3107_v43, %v1294_v38  ;;  %v1360_v7 = vpop.f32.mrf.mxu1 }
 0x332   :  { %v1344_v12 = vadd.f32 %v1343_v53, %v1295_v11 }
 0x334   :  { %v1377_v14 = vmax.f32 %v1344_v12, 0.0 }
 0x336   :  { %v1393_v15 = vpack.c.bf16 %v1377_v14, %v1377_v14 }
 0x337   :  { %v1296_v17 = vpop.f32.mrf.mxu0  ;;  %v2455_v19 = vld [vmem:[#allocation2 + $0x18] sm:$0xf0] }
 0x338   :  { %1409 = vst [vmem:[#allocation2 + $0x24] sm:$0xf] %v1393_v15  ;;  %v1297_v20 = vadd.f32 %v3107_v43, %v1296_v17  ;;  %v2458_v23 = vor.u32 %v2685_v18, %v2455_v19 }
 0x33a   :  { %v1346_v28 = vadd.f32 %v1345_v62, %v1297_v20  ;;  %1936 = vmatmul.bf16.gmra.mxu0 %v2458_v23  ;;  %v1363_v20 = vpop.f32.mrf.mxu1 }
 0x33c   :  { %v1378_v29 = vmax.f32 %v1346_v28, 0.0 }
 0x33e   :  { %v1394_v30 = vpack.c.bf16 %v1378_v29, %v1378_v29 }
 0x33f   :  { %v1299_v32 = vpop.f32.mrf.mxu0  ;;  %v2687_v45 = vld [vmem:[#allocation2 + $0x24] sm:$0xf] }
 0x340   :  { %1410 = vst [vmem:[#allocation2 + $0x2c] sm:$0xf] %v1394_v30  ;;  %v1300_v33 = vadd.f32 %v3107_v43, %v1299_v32 }
 0x342   :  { %v1349_v35 = vadd.f32 %v1348_v9, %v1300_v33  ;;  %v1365_v33 = vpop.f32.mrf.mxu1 }
 0x344   :  { %v1379_v41 = vmax.f32 %v1349_v35, 0.0 }
 0x346   :  { %v1395_v42 = vpack.c.bf16 %v1379_v41, %v1379_v41 }
 0x347   :  { %v1301_v44 = vpop.f32.mrf.mxu0  ;;  %v2463_v46 = vld [vmem:[#allocation2 + $0x28] sm:$0xf0] }
 0x348   :  { %1411 = vst [vmem:[#allocation2 + $0x34] sm:$0xf] %v1395_v42  ;;  %v1302_v47 = vadd.f32 %v3107_v43, %v1301_v44  ;;  %v2466_v48 = vor.u32 %v2687_v45, %v2463_v46 }
 0x34a   :  { %v1351_v49 = vadd.f32 %v1350_v25, %v1302_v47  ;;  %1941 = vmatmul.bf16.gmra.mxu0 %v2466_v48 }
 0x34c   :  { %v1380_v50 = vmax.f32 %v1351_v49, 0.0  ;;  %v1368_v49 = vpop.f32.mrf.mxu1 }
 0x34e   :  { %v1396_v52 = vpack.c.bf16 %v1380_v50, %v1380_v50 }
 0x34f   :  { %v1304_v53 = vpop.f32.mrf.mxu0  ;;  %v2689_v62 = vld [vmem:[#allocation2 + $0x34] sm:$0xf] }
 0x350   :  { %1412 = vst [vmem:[#allocation2 + $0x3c] sm:$0xf] %v1396_v52  ;;  %v1305_v54 = vadd.f32 %v3107_v43, %v1304_v53 }
 0x352   :  { %v1354_v55 = vadd.f32 %v1353_v37, %v1305_v54 }
 0x354   :  { %v1381_v58 = vmax.f32 %v1354_v55, 0.0 }
 0x356   :  { %v1397_v59 = vpack.c.bf16 %v1381_v58, %v1381_v58 }
 0x357   :  { %v1306_v61 = vpop.f32.mrf.mxu0  ;;  %v2471_v63 = vld [vmem:[#allocation2 + $0x38] sm:$0xf0] }
 0x358   :  { %1413 = vst [vmem:[#allocation2 + $0x44] sm:$0xf] %v1397_v59  ;;  %v1307_v0 = vadd.f32 %v3107_v43, %v1306_v61  ;;  %v2474_v1 = vor.u32 %v2689_v62, %v2471_v63  ;;  %v1370_v62 = vpop.f32.mrf.mxu1 }
 0x35a   :  { %v1356_v2 = vadd.f32 %v1355_v51, %v1307_v0  ;;  %1946 = vmatmul.bf16.gmra.mxu0 %v2474_v1 }
 0x35c   :  { %v1382_v3 = vmax.f32 %v1356_v2, 0.0 }
 0x35e   :  { %v1398_v4 = vpack.c.bf16 %v1382_v3, %v1382_v3 }
 0x35f   :  { %v1309_v5 = vpop.f32.mrf.mxu0  ;;  %v2691_v14 = vld [vmem:[#allocation2 + $0x44] sm:$0xf] }
 0x360   :  { %1414 = vst [vmem:[#allocation2 + $0x4c] sm:$0xf] %v1398_v4  ;;  %v1310_v6 = vadd.f32 %v3107_v43, %v1309_v5 }
 0x362   :  { %v1359_v9 = vadd.f32 %v1358_v60, %v1310_v6 }
 0x364   :  { %v1383_v38 = vmax.f32 %v1359_v9, 0.0 }
 0x366   :  { %v1399_v11 = vpack.c.bf16 %v1383_v38, %v1383_v38 }
 0x367   :  { %v1311_v12 = vpop.f32.mrf.mxu0  ;;  %v2479_v15 = vld [vmem:[#allocation2 + $0x48] sm:$0xf0] }
 0x368   :  { %1415 = vst [vmem:[#allocation2 + $0x54] sm:$0xf] %v1399_v11  ;;  %v1312_v17 = vadd.f32 %v3107_v43, %v1311_v12  ;;  %v2482_v18 = vor.u32 %v2691_v14, %v2479_v15  ;;  %v2679_v15 = vld [vmem:[#allocation2 + $0x48] sm:$0xf0] }
 0x36a   :  { %v1361_v19 = vadd.f32 %v1360_v7, %v1312_v17  ;;  %1951 = vmatmul.bf16.gmra.mxu0 %v2482_v18  ;;  %v2429_v17 = vld [vmem:[#allocation2 + $0x44] sm:$0xf] }
 0x36b   :  { %v2430_v18 = vor.u32 %v2679_v15, %v2429_v17 }
 0x36c   :  { %v1384_v23 = vmax.f32 %v1361_v19, 0.0  ;;  %v2678_v19 = vld [vmem:[#allocation2 + $0x38] sm:$0xf0] }
 0x36e   :  { %v1400_v25 = vpack.c.bf16 %v1384_v23, %v1384_v23 }
 0x36f   :  { %v1314_v28 = vpop.f32.mrf.mxu0  ;;  %v2693_v41 = vld [vmem:[#allocation2 + $0x54] sm:$0xf] }
 0x370   :  { %1416 = vst [vmem:[#allocation2 + $0x5c] sm:$0xf] %v1400_v25  ;;  %v1315_v29 = vadd.f32 %v3107_v43, %v1314_v28  ;;  %v2677_v25 = vld [vmem:[#allocation2 + $0x28] sm:$0xf0]  ;;  %v2421_v28 = vld [vmem:[#allocation2 + $0x24] sm:$0xf] }
 0x372   :  { %v1364_v30 = vadd.f32 %v1363_v20, %v1315_v29  ;;  %v2425_v20 = vld [vmem:[#allocation2 + $0x34] sm:$0xf]  ;;  %v2422_v29 = vor.u32 %v2677_v25, %v2421_v28 }
 0x373   :  { %v2426_v23 = vor.u32 %v2678_v19, %v2425_v20 }
 0x374   :  { %v1385_v32 = vmax.f32 %v1364_v30, 0.0  ;;  %v2676_v30 = vld [vmem:[#allocation2 + $0x18] sm:$0xf0] }
 0x376   :  { %v1401_v35 = vpack.c.bf16 %v1385_v32, %v1385_v32  ;;  %v2417_v32 = vld [vmem:[#allocation2 + $0x14] sm:$0xf] }
 0x377   :  { %v1316_v37 = vpop.f32.mrf.mxu0  ;;  %v2487_v42 = vld [vmem:[#allocation2 + $0x58] sm:$0xf0] }
 0x378   :  { %1417 = vst [vmem:[#allocation2 + $0x64] sm:$0xf] %v1401_v35  ;;  %v1317_v44 = vadd.f32 %v3107_v43, %v1316_v37  ;;  %v2490_v45 = vor.u32 %v2693_v41, %v2487_v42  ;;  %v2680_v12 = vld [vmem:[#allocation2 + $0x58] sm:$0xf0]  ;;  %v2675_v35 = vld [vmem:[#allocation2 + $0x8] sm:$0xf0] }
 0x379   :  { %v2413_v37 = vld [vmem:[#allocation2 + $0x4] sm:$0xf] }
 0x37a   :  { %v1366_v46 = vadd.f32 %v1365_v33, %v1317_v44  ;;  %1956 = vmatmul.bf16.gmra.mxu0 %v2490_v45  ;;  %v2418_v33 = vor.u32 %v2676_v30, %v2417_v32  ;;  %v2414_v41 = vor.u32 %v2675_v35, %v2413_v37  ;;  %v2667_v42 = vld [vmem:[#allocation3] sm:$0xff]  ;;  %v2668_v44 = vld [vmem:[#allocation3 + $0x8] sm:$0xff]  ;;  %v2669_v45 = vld [vmem:[#allocation3 + $0x10] sm:$0xff] }
 0x37c   :  { %v1386_v47 = vmax.f32 %v1366_v46, 0.0  ;;  %v2670_v46 = vld [vmem:[#allocation3 + $0x18] sm:$0xff] }
 0x37e   :  { %v1402_v48 = vpack.c.bf16 %v1386_v47, %v1386_v47  ;;  %v2671_v47 = vld [vmem:[#allocation3 + $0x20] sm:$0xff] }
 0x37f   :  { %v1319_v50 = vpop.f32.mrf.mxu0  ;;  %v2695_v58 = vld [vmem:[#allocation2 + $0x64] sm:$0xf] }
 0x380   :  { %1418 = vst [vmem:[#allocation2 + $0x6c] sm:$0xf] %v1402_v48  ;;  %v1320_v51 = vadd.f32 %v3107_v43, %v1319_v50  ;;  %v2437_v38 = vld [vmem:[#allocation2 + $0x64] sm:$0xf]  ;;  %v2672_v48 = vld [vmem:[#allocation3 + $0x28] sm:$0xff]  ;;  %v2705_v50 = vld [vmem:[#allocation8 + $0x30] sm:$0xff] }
 0x382   :  { %v1369_v52 = vadd.f32 %v1368_v49, %v1320_v51  ;;  %v2706_v49 = vld [vmem:[#allocation8 + $0x38] sm:$0xff]  ;;  %v2673_v51 = vld [vmem:[#allocation3 + $0x30] sm:$0xff] }
 0x383   :  { %1874 = vmatpush.bf16.msra.mxu3 %v2706_v49 }
 0x384   :  { %v1387_v53 = vmax.f32 %v1369_v52, 0.0  ;;  %v2704_v52 = vld [vmem:[#allocation8 + $0x28] sm:$0xff] }
 0x386   :  { %v1403_v54 = vpack.c.bf16 %v1387_v53, %v1387_v53  ;;  %v2703_v53 = vld [vmem:[#allocation8 + $0x20] sm:$0xff] }
 0x387   :  { %v1321_v55 = vpop.f32.mrf.mxu0  ;;  %v2495_v59 = vld [vmem:[#allocation2 + $0x68] sm:$0xf0]  ;;  %1875 = vmatpush.bf16.msra.mxu3 %v2705_v50 }
 0x388   :  { %1419 = vst [vmem:[#allocation2 + $0x74] sm:$0xf] %v1403_v54  ;;  %v1322_v60 = vadd.f32 %v3107_v43, %v1321_v55  ;;  %v2498_v61 = vor.u32 %v2695_v58, %v2495_v59  ;;  %v2681_v9 = vld [vmem:[#allocation2 + $0x68] sm:$0xf0]  ;;  %v2433_v43 = vld [vmem:[#allocation2 + $0x54] sm:$0xf] }
 0x389   :  { %v2438_v11 = vor.u32 %v2681_v9, %v2437_v38  ;;  %v2434_v14 = vor.u32 %v2680_v12, %v2433_v43  ;;  %v2702_v54 = vld [vmem:[#allocation8 + $0x18] sm:$0xff]  ;;  %v2701_v58 = vld [vmem:[#allocation8 + $0x10] sm:$0xff]  ;;  %v2700_v59 = vld [vmem:[#allocation8 + $0x8] sm:$0xff] }
 0x38a   :  { %v1371_v63 = vadd.f32 %v1370_v62, %v1322_v60  ;;  %1961 = vmatmul.bf16.gmra.mxu0 %v2498_v61  ;;  %v2674_v55 = vld [vmem:[#allocation3 + $0x38] sm:$0xff]  ;;  %v2699_v60 = vld [vmem:[#allocation8] sm:$0xff] }
 0x38b   :  { %1876 = vmatpush.bf16.msra.mxu3 %v2704_v52 }
 0x38c   :  { %v1388_v0 = vmax.f32 %v1371_v63, 0.0 }
 0x38e   :  { %v1404_v1 = vpack.c.bf16 %v1388_v0, %v1388_v0 }
 0x38f   :  { %v2441_v2 = vld [vmem:[#allocation2 + $0x74] sm:$0xf]  ;;  %1877 = vmatpush.bf16.msra.mxu3 %v2703_v53 }
 0x390   :  { %1420 = vst [vmem:[#allocation2 + $0x7c] sm:$0xf] %v1404_v1  ;;  %v2697_v4 = vld [vmem:[#allocation2 + $0x74] sm:$0xf] }
 0x393   :  { %1878 = vmatpush.bf16.msra.mxu3 %v2702_v54 }
 0x397   :  { %v2682_v3 = vld [vmem:[#allocation2 + $0x78] sm:$0xf0]  ;;  %1879 = vmatpush.bf16.msra.mxu3 %v2701_v58 }
 0x398   :  { %v2503_v5 = vld [vmem:[#allocation2 + $0x78] sm:$0xf0]  ;;  %v2442_v6 = vor.u32 %v2682_v3, %v2441_v2 }
 0x399   :  { %v2506_v7 = vor.u32 %v2697_v4, %v2503_v5 }
 0x39a   :  { %1549 = vmatpush.bf16.msra.mxu2 %v2442_v6 }
 0x39b   :  { %1966 = vmatmul.bf16.gmra.mxu0 %v2506_v7  ;;  %1880 = vmatpush.bf16.msra.mxu3 %v2700_v59 }
 0x39e   :  { %1550 = vmatpush.bf16.msra.mxu2 %v2438_v11 }
 0x39f   :  { %1881 = vmatpush.bf16.msra.mxu3 %v2699_v60 }
 0x3a2   :  { %1551 = vmatpush.bf16.msra.mxu2 %v2434_v14 }
 0x3a6   :  { %1552 = vmatpush.bf16.msra.mxu2 %v2430_v18 }
 0x3aa   :  { %1553 = vmatpush.bf16.msra.mxu2 %v2426_v23 }
 0x3ae   :  { %1554 = vmatpush.bf16.msra.mxu2 %v2422_v29 }
 0x3b2   :  { %1555 = vmatpush.bf16.msra.mxu2 %v2418_v33 }
 0x3b6   :  { %1556 = vmatpush.bf16.msra.mxu2 %v2414_v41 }
 0x3b9   :  { %1557 = vmatmul.bf16.vlgmr.msra.gmra.mxu2 %v2667_v42 }
 0x3c9   :  { %1562 = vmatmul.bf16.gmra.mxu2 %v2668_v44 }
 0x3d9   :  { %1567 = vmatmul.bf16.gmra.mxu2 %v2669_v45 }
 0x3e9   :  { %1572 = vmatmul.bf16.gmra.mxu2 %v2670_v46 }
 0x3f9   :  { %1577 = vmatmul.bf16.gmra.mxu2 %v2671_v47 }
 0x409   :  { %1582 = vmatmul.bf16.gmra.mxu2 %v2672_v48 }
 0x419   :  { %1587 = vmatmul.bf16.gmra.mxu2 %v2673_v51 }
 0x429   :  { %1592 = vmatmul.bf16.gmra.mxu2 %v2674_v55 }
 0x43c   :  { %v1558_v61 = vpop.f32.mrf.mxu2 }
 0x43d   :  { %v1598_v62 = vmul.f32 %v1558_v61, %v2992_v8 }
 0x43f   :  { %v1614_v63 = vpack.c.bf16 %v1598_v62, %v1598_v62 }
 0x441   :  { %1630 = vst [vmem:[#allocation2] sm:$0xf] %v1614_v63 }
 0x444   :  { %v1560_v0 = vpop.f32.mrf.mxu2 }
 0x445   :  { %v1599_v1 = vmul.f32 %v1560_v0, %v3014_v16 }
 0x447   :  { %v1615_v2 = vpack.c.bf16 %v1599_v1, %v1599_v1 }
 0x448   :  { %v2445_v6 = vld [vmem:[#allocation2] sm:$0xf] }
 0x449   :  { %1631 = vst [vmem:[#allocation2 + $0x8] sm:$0xf] %v1615_v2 }
 0x44c   :  { %v1563_v3 = vpop.f32.mrf.mxu2 }
 0x44d   :  { %v1600_v4 = vmul.f32 %v1563_v3, %v3006_v13 }
 0x44f   :  { %v1616_v5 = vpack.c.bf16 %v1600_v4, %v1600_v4 }
 0x450   :  { %v2684_v7 = vld [vmem:[#allocation2 + $0x4] sm:$0xf0] }
 0x451   :  { %1632 = vst [vmem:[#allocation2 + $0x10] sm:$0xf] %v1616_v5  ;;  %v2446_v9 = vor.u32 %v2684_v7, %v2445_v6  ;;  %v1932_v5 = vpop.f32.mrf.mxu0 }
 0x453   :  { %1882 = vmatmul.bf16.vlgmr.msra.gmra.mxu3 %v2446_v9 }
 0x454   :  { %v1565_v38 = vpop.f32.mrf.mxu2 }
 0x455   :  { %v1601_v11 = vmul.f32 %v1565_v38, %v3021_v22 }
 0x457   :  { %v1617_v8 = vpack.c.bf16 %v1601_v11, %v1601_v11 }
 0x458   :  { %v2453_v14 = vld [vmem:[#allocation2 + $0x10] sm:$0xf] }
 0x459   :  { %1633 = vst [vmem:[#allocation2 + $0x18] sm:$0xf] %v1617_v8  ;;  %v1934_v9 = vpop.f32.mrf.mxu0 }
 0x45c   :  { %v1568_v12 = vpop.f32.mrf.mxu2 }
 0x45d   :  { %v1602_v43 = vmul.f32 %v1568_v12, %v3019_v21 }
 0x45f   :  { %v1618_v16 = vpack.c.bf16 %v1602_v43, %v1602_v43 }
 0x460   :  { %v2686_v15 = vld [vmem:[#allocation2 + $0x14] sm:$0xf0] }
 0x461   :  { %1634 = vst [vmem:[#allocation2 + $0x20] sm:$0xf] %v1618_v16  ;;  %v2454_v17 = vor.u32 %v2686_v15, %v2453_v14  ;;  %v1937_v38 = vpop.f32.mrf.mxu0 }
 0x463   :  { %1887 = vmatmul.bf16.gmra.mxu3 %v2454_v17 }
 0x464   :  { %v1570_v13 = vpop.f32.mrf.mxu2 }
 0x465   :  { %v1603_v18 = vmul.f32 %v1570_v13, %v3031_v26 }
 0x467   :  { %v1619_v19 = vpack.c.bf16 %v1603_v18, %v1603_v18 }
 0x468   :  { %v2461_v25 = vld [vmem:[#allocation2 + $0x20] sm:$0xf] }
 0x469   :  { %1635 = vst [vmem:[#allocation2 + $0x28] sm:$0xf] %v1619_v19  ;;  %v1939_v12 = vpop.f32.mrf.mxu0 }
 0x46c   :  { %v1573_v20 = vpop.f32.mrf.mxu2 }
 0x46d   :  { %v1604_v23 = vmul.f32 %v1573_v20, %v3026_v24 }
 0x46f   :  { %v1620_v22 = vpack.c.bf16 %v1604_v23, %v1604_v23 }
 0x470   :  { %v2688_v28 = vld [vmem:[#allocation2 + $0x24] sm:$0xf0] }
 0x471   :  { %1636 = vst [vmem:[#allocation2 + $0x30] sm:$0xf] %v1620_v22  ;;  %v2462_v29 = vor.u32 %v2688_v28, %v2461_v25  ;;  %v1942_v15 = vpop.f32.mrf.mxu0 }
 0x473   :  { %1892 = vmatmul.bf16.gmra.mxu3 %v2462_v29 }
 0x474   :  { %v1575_v21 = vpop.f32.mrf.mxu2 }
 0x475   :  { %v1605_v30 = vmul.f32 %v1575_v21, %v3033_v27 }
 0x477   :  { %v1621_v32 = vpack.c.bf16 %v1605_v30, %v1605_v30 }
 0x478   :  { %v2469_v37 = vld [vmem:[#allocation2 + $0x30] sm:$0xf] }
 0x479   :  { %1637 = vst [vmem:[#allocation2 + $0x38] sm:$0xf] %v1621_v32  ;;  %v1944_v19 = vpop.f32.mrf.mxu0 }
 0x47c   :  { %v1578_v33 = vpop.f32.mrf.mxu2 }
 0x47d   :  { %v1606_v35 = vmul.f32 %v1578_v33, %v3039_v36 }
 0x47f   :  { %v1622_v26 = vpack.c.bf16 %v1606_v35, %v1606_v35 }
 0x480   :  { %v2690_v41 = vld [vmem:[#allocation2 + $0x34] sm:$0xf0] }
 0x481   :  { %1638 = vst [vmem:[#allocation2 + $0x40] sm:$0xf] %v1622_v26  ;;  %v2470_v42 = vor.u32 %v2690_v41, %v2469_v37  ;;  %v1947_v25 = vpop.f32.mrf.mxu0 }
 0x483   :  { %1897 = vmatmul.bf16.gmra.mxu3 %v2470_v42 }
 0x484   :  { %v1580_v24 = vpop.f32.mrf.mxu2 }
 0x485   :  { %v1607_v44 = vmul.f32 %v1580_v24, %v3035_v31 }
 0x487   :  { %v1623_v45 = vpack.c.bf16 %v1607_v44, %v1607_v44 }
 0x488   :  { %v2477_v48 = vld [vmem:[#allocation2 + $0x40] sm:$0xf] }
 0x489   :  { %1639 = vst [vmem:[#allocation2 + $0x48] sm:$0xf] %v1623_v45  ;;  %v1949_v33 = vpop.f32.mrf.mxu0 }
 0x48c   :  { %v1583_v46 = vpop.f32.mrf.mxu2 }
 0x48d   :  { %v1608_v47 = vmul.f32 %v1583_v46, %v3041_v39 }
 0x48f   :  { %v1624_v27 = vpack.c.bf16 %v1608_v47, %v1608_v47 }
 0x490   :  { %v2692_v49 = vld [vmem:[#allocation2 + $0x44] sm:$0xf0] }
 0x491   :  { %1640 = vst [vmem:[#allocation2 + $0x50] sm:$0xf] %v1624_v27  ;;  %v2478_v50 = vor.u32 %v2692_v49, %v2477_v48  ;;  %v1952_v42 = vpop.f32.mrf.mxu0 }
 0x493   :  { %1902 = vmatmul.bf16.gmra.mxu3 %v2478_v50 }
 0x494   :  { %v1585_v36 = vpop.f32.mrf.mxu2 }
 0x495   :  { %v1609_v51 = vmul.f32 %v1585_v36, %v3049_v56 }
 0x497   :  { %v1625_v52 = vpack.c.bf16 %v1609_v51, %v1609_v51 }
 0x498   :  { %v2485_v55 = vld [vmem:[#allocation2 + $0x50] sm:$0xf] }
 0x499   :  { %1641 = vst [vmem:[#allocation2 + $0x58] sm:$0xf] %v1625_v52  ;;  %v1954_v46 = vpop.f32.mrf.mxu0 }
 0x49c   :  { %v1588_v53 = vpop.f32.mrf.mxu2 }
 0x49d   :  { %v1610_v54 = vmul.f32 %v1588_v53, %v3043_v40 }
 0x49f   :  { %v1626_v31 = vpack.c.bf16 %v1610_v54, %v1610_v54 }
 0x4a0   :  { %v2694_v58 = vld [vmem:[#allocation2 + $0x54] sm:$0xf0] }
 0x4a1   :  { %1642 = vst [vmem:[#allocation2 + $0x60] sm:$0xf] %v1626_v31  ;;  %v2486_v59 = vor.u32 %v2694_v58, %v2485_v55  ;;  %v1957_v49 = vpop.f32.mrf.mxu0 }
 0x4a3   :  { %1907 = vmatmul.bf16.gmra.mxu3 %v2486_v59 }
 0x4a4   :  { %v1590_v39 = vpop.f32.mrf.mxu2 }
 0x4a5   :  { %v1611_v60 = vmul.f32 %v1590_v39, %v3051_v57 }
 0x4a7   :  { %v1627_v61 = vpack.c.bf16 %v1611_v60, %v1611_v60 }
 0x4a8   :  { %v2493_v0 = vld [vmem:[#allocation2 + $0x60] sm:$0xf] }
 0x4a9   :  { %1643 = vst [vmem:[#allocation2 + $0x68] sm:$0xf] %v1627_v61  ;;  %v1959_v54 = vpop.f32.mrf.mxu0 }
 0x4ac   :  { %v1593_v62 = vpop.f32.mrf.mxu2 }
 0x4ad   :  { %v1612_v63 = vmul.f32 %v1593_v62, %v3057_v10  ;;  %v3144_v10 = vld [vmem:[%s3218_s8] ss:$0 sm:$0xff] }
 0x4af   :  { %v1628_v56 = vpack.c.bf16 %v1612_v63, %v1612_v63 }
 0x4b0   :  { %v2696_v1 = vld [vmem:[#allocation2 + $0x64] sm:$0xf0] }
 0x4b1   :  { %1644 = vst [vmem:[#allocation2 + $0x70] sm:$0xf] %v1628_v56  ;;  %v2494_v2 = vor.u32 %v2696_v1, %v2493_v0  ;;  %v1962_v39 = vpop.f32.mrf.mxu0 }
 0x4b3   :  { %1912 = vmatmul.bf16.gmra.mxu3 %v2494_v2 }
 0x4b4   :  { %v1595_v40 = vpop.f32.mrf.mxu2 }
 0x4b5   :  { %v1613_v3 = vmul.f32 %v1595_v40, %v3063_v34 }
 0x4b7   :  { %v1629_v4 = vpack.c.bf16 %v1613_v3, %v1613_v3 }
 0x4b8   :  { %v2501_v6 = vld [vmem:[#allocation2 + $0x70] sm:$0xf] }
 0x4b9   :  { %1645 = vst [vmem:[#allocation2 + $0x78] sm:$0xf] %v1629_v4  ;;  %v1964_v63 = vpop.f32.mrf.mxu0 }
 0x4c0   :  { %v2698_v7 = vld [vmem:[#allocation2 + $0x74] sm:$0xf0] }
 0x4c1   :  { %v2502_v57 = vor.u32 %v2698_v7, %v2501_v6  ;;  %v1967_v2 = vpop.f32.mrf.mxu0 }
 0x4c3   :  { %1917 = vmatmul.bf16.gmra.mxu3 %v2502_v57 }
 0x4c9   :  { %v1969_v7 = vpop.f32.mrf.mxu0 }
 0x4d6   :  { %v1883_v11 = vpop.f32.mrf.mxu3 }
 0x4d7   :  { %v1884_v8 = vadd.f32 %v3144_v10, %v1883_v11 }
 0x4d9   :  { %v1933_v43 = vadd.f32 %v1932_v5, %v1884_v8 }
 0x4db   :  { %1972 = vst [vmem:[%s3219_s9] sm:$0xff] %v1933_v43 }
 0x4de   :  { %v1885_v34 = vpop.f32.mrf.mxu3 }
 0x4df   :  { %v1886_v16 = vadd.f32 %v3144_v10, %v1885_v34 }
 0x4e1   :  { %v1935_v14 = vadd.f32 %v1934_v9, %v1886_v16 }
 0x4e3   :  { %1973 = vst [vmem:[%s3219_s9 + $0x8] sm:$0xff] %v1935_v14 }
 0x4e6   :  { %v1888_v17 = vpop.f32.mrf.mxu3 }
 0x4e7   :  { %v1889_v13 = vadd.f32 %v3144_v10, %v1888_v17 }
 0x4e9   :  { %v1938_v18 = vadd.f32 %v1937_v38, %v1889_v13 }
 0x4eb   :  { %1974 = vst [vmem:[%s3219_s9 + $0x10] sm:$0xff] %v1938_v18 }
 0x4ee   :  { %v1890_v20 = vpop.f32.mrf.mxu3 }
 0x4ef   :  { %v1891_v23 = vadd.f32 %v3144_v10, %v1890_v20 }
 0x4f1   :  { %v1940_v22 = vadd.f32 %v1939_v12, %v1891_v23 }
 0x4f3   :  { %1975 = vst [vmem:[%s3219_s9 + $0x18] sm:$0xff] %v1940_v22 }
 0x4f6   :  { %v1893_v28 = vpop.f32.mrf.mxu3 }
 0x4f7   :  { %v1894_v29 = vadd.f32 %v3144_v10, %v1893_v28 }
 0x4f9   :  { %v1943_v21 = vadd.f32 %v1942_v15, %v1894_v29 }
 0x4fb   :  { %1976 = vst [vmem:[%s3219_s9 + $0x20] sm:$0xff] %v1943_v21 }
 0x4fe   :  { %v1895_v30 = vpop.f32.mrf.mxu3 }
 0x4ff   :  { %v1896_v32 = vadd.f32 %v3144_v10, %v1895_v30 }
 0x501   :  { %v1945_v35 = vadd.f32 %v1944_v19, %v1896_v32 }
 0x503   :  { %1977 = vst [vmem:[%s3219_s9 + $0x28] sm:$0xff] %v1945_v35 }
 0x506   :  { %v1898_v26 = vpop.f32.mrf.mxu3 }
 0x507   :  { %v1899_v37 = vadd.f32 %v3144_v10, %v1898_v26 }
 0x509   :  { %v1948_v41 = vadd.f32 %v1947_v25, %v1899_v37 }
 0x50b   :  { %1978 = vst [vmem:[%s3219_s9 + $0x30] sm:$0xff] %v1948_v41 }
 0x50e   :  { %v1900_v24 = vpop.f32.mrf.mxu3 }
 0x50f   :  { %v1901_v44 = vadd.f32 %v3144_v10, %v1900_v24 }
 0x511   :  { %v1950_v45 = vadd.f32 %v1949_v33, %v1901_v44 }
 0x513   :  { %1979 = vst [vmem:[%s3219_s9 + $0x38] sm:$0xff] %v1950_v45 }
 0x516   :  { %v1903_v47 = vpop.f32.mrf.mxu3 }
 0x517   :  { %v1904_v27 = vadd.f32 %v3144_v10, %v1903_v47 }
 0x519   :  { %v1953_v48 = vadd.f32 %v1952_v42, %v1904_v27 }
 0x51b   :  { %1980 = vst [vmem:[%s3219_s9 + $0x40] sm:$0xff] %v1953_v48 }
 0x51e   :  { %v1905_v50 = vpop.f32.mrf.mxu3 }
 0x51f   :  { %v1906_v36 = vadd.f32 %v3144_v10, %v1905_v50 }
 0x521   :  { %v1955_v51 = vadd.f32 %v1954_v46, %v1906_v36 }
 0x523   :  { %1981 = vst [vmem:[%s3219_s9 + $0x48] sm:$0xff] %v1955_v51 }
 0x526   :  { %v1908_v52 = vpop.f32.mrf.mxu3 }
 0x527   :  { %v1909_v53 = vadd.f32 %v3144_v10, %v1908_v52 }
 0x529   :  { %v1958_v31 = vadd.f32 %v1957_v49, %v1909_v53 }
 0x52b   :  { %1982 = vst [vmem:[%s3219_s9 + $0x50] sm:$0xff] %v1958_v31 }
 0x52e   :  { %v1910_v55 = vpop.f32.mrf.mxu3 }
 0x52f   :  { %v1911_v58 = vadd.f32 %v3144_v10, %v1910_v55 }
 0x531   :  { %v1960_v59 = vadd.f32 %v1959_v54, %v1911_v58 }
 0x533   :  { %1983 = vst [vmem:[%s3219_s9 + $0x58] sm:$0xff] %v1960_v59 }
 0x536   :  { %v1913_v60 = vpop.f32.mrf.mxu3 }
 0x537   :  { %v1914_v61 = vadd.f32 %v3144_v10, %v1913_v60 }
 0x539   :  { %v1963_v62 = vadd.f32 %v1962_v39, %v1914_v61 }
 0x53b   :  { %1984 = vst [vmem:[%s3219_s9 + $0x60] sm:$0xff] %v1963_v62 }
 0x53e   :  { %v1915_v56 = vpop.f32.mrf.mxu3 }
 0x53f   :  { %v1916_v0 = vadd.f32 %v3144_v10, %v1915_v56 }
 0x541   :  { %v1965_v1 = vadd.f32 %v1964_v63, %v1916_v0 }
 0x543   :  { %1985 = vst [vmem:[%s3219_s9 + $0x68] sm:$0xff] %v1965_v1 }
 0x546   :  { %v1918_v40 = vpop.f32.mrf.mxu3 }
 0x547   :  { %v1919_v3 = vadd.f32 %v3144_v10, %v1918_v40 }
 0x549   :  { %v1968_v4 = vadd.f32 %v1967_v2, %v1919_v3 }
 0x54b   :  { %1986 = vst [vmem:[%s3219_s9 + $0x70] sm:$0xff] %v1968_v4 }
 0x54e   :  { %v1920_v5 = vpop.f32.mrf.mxu3 }
 0x54f   :  { %v1921_v6 = vadd.f32 %v3144_v10, %v1920_v5 }
 0x551   :  { %v1970_v57 = vadd.f32 %v1969_v7, %v1921_v6 }
 0x553   :  { %1987 = vst [vmem:[%s3219_s9 + $0x78] sm:$0xff] %v1970_v57 }
 0x554   :  { %1992 = vsyncpa [#allocation4], 1 }
 0x555   :  { %1993 = vsyncpa [#allocation6], 1 }
 0x556   :  { %1994 = vsyncpa [#allocation9], 1 }

</bundles_post_ra>
